<compile_context>
chip_gen: v5e
topology: v5e:2x2
jax: 0.10.0
libtpu: 0.0.40
codegen_flags: <defaults>
</compile_context>

<pallas_src>
import jax
import jax.numpy as jnp
import numpy as np
from jax.experimental import pallas as pl
from jax.experimental.pallas import tpu as pltpu

# ---------------- problem sizes (small, consistent with the module) ----------
T = 8            # max sequence length
B = 4            # real batch
B_PAD = 8        # padded batch (fills f32 sublane group exactly)
IN_FEAT = 16     # features of packed input data (input_module in)
INPUT_SIZE = 32  # RNN input_size (input_module out)
HIDDEN = 32      # RNN hidden_size
OUT_FEAT = 16    # output_module out features


# ---------------- Pallas kernel ----------------------------------------------
def wrapped_lstm_kernel(
    # inputs (whole-array VMEM blocks, single grid step)
    x_ref,        # (T*Bp, IN_FEAT)  bf16  time-major padded data, flattened (T,Bp)
    act_ref,      # (T*Bp, 1)        f32   activity mask (1.0 if t < length[b])
    h0_ref,       # (Bp, H)          f32
    c0_ref,       # (Bp, H)          f32
    w_comb_ref,   # (IN_FEAT, 4H)    bf16  w_in @ w_ih (g-cols pre-scaled by 2)
    w_hh_ref,     # (H, 4H)          bf16  LSTM weight_hh (g-cols pre-scaled by 2)
    b_comb_ref,   # (1, 4H)          f32   b_in @ w_ih + b_ih + b_hh (g-cols *2)
    w_out_ref,    # (H, OUT_FEAT)    bf16  output_module weight (transposed)
    b_out_ref,    # (1, OUT_FEAT)    f32
    # outputs
    y_ref,        # (T*Bp, OUT_FEAT) f32   flattened padded output
    hT_ref,       # (Bp, H)          f32   final hidden
    cT_ref,       # (Bp, H)          f32   final cell
    # scratch
    h_scr,        # (T*Bp, H)        f32   per-step h_new collector
):
    H = h0_ref.shape[-1]
    Bk = h0_ref.shape[0]
    Tk = x_ref.shape[0] // Bk

    # ---- all timestep input contributions in ONE MXU call --------------------
    gx = (jnp.dot(x_ref[...], w_comb_ref[...],
                  preferred_element_type=jnp.float32)
          + b_comb_ref[...])                               # (T*Bp, 4H) f32

    act_all = act_ref[...]                                 # (T*Bp, 1) f32 0/1
    w_hh = w_hh_ref[...]                                   # (H, 4H) bf16
    h = h0_ref[...]                                        # (Bp, H) f32
    c = c0_ref[...]                                        # (Bp, H) f32

    # ---- fully unrolled recurrence: only h @ w_hh on the serial chain --------
    for t in range(Tk):
        gates = gx[t * Bk:(t + 1) * Bk, :] + jnp.dot(
            h.astype(jnp.bfloat16), w_hh,
            preferred_element_type=jnp.float32)            # (Bp, 4H) f32

        # single EUP pass over the full gates vreg; g-gate via tanh(x)=2*sig(2x)-1
        sig = jax.nn.sigmoid(gates)                        # (Bp, 4H)
        i_g = sig[:, 0 * H:1 * H]
        f_g = sig[:, 1 * H:2 * H]
        g_g = 2.0 * sig[:, 2 * H:3 * H] - 1.0              # g-cols pre-scaled by 2
        o_g = sig[:, 3 * H:4 * H]

        c_new = f_g * c + i_g * g_g
        h_new = o_g * jnp.tanh(c_new)

        # collect h_new for the batched output projection (aligned (8,H) store)
        h_scr[t * Bk:(t + 1) * Bk, :] = h_new

        # PackedSequence masking: freeze state for finished sequences.
        # a in {0,1} so a*h_new + (1-a)*h is an exact select.
        a = act_all[t * Bk:(t + 1) * Bk, :]                # (Bp, 1)
        na = 1.0 - a
        h = a * h_new + na * h
        c = a * c_new + na * c

    # ---- batched output projection + single bulk writeback -------------------
    y = (jnp.dot(h_scr[...].astype(jnp.bfloat16), w_out_ref[...],
                 preferred_element_type=jnp.float32)
         + b_out_ref[...])                                 # (T*Bp, OUT_FEAT)
    y_ref[...] = (y * act_all).astype(y_ref.dtype)

    # final hidden / cell state, written exactly once
    hT_ref[...] = h.astype(hT_ref.dtype)
    cT_ref[...] = c.astype(cT_ref.dtype)


def wrapped_rnn_forward(x, lengths, h0, c0, params):
    """x: (T, B, IN_FEAT) padded time-major data, lengths: (B,) int32,
    h0/c0: (B, HIDDEN). Returns (y_padded (T,B,OUT_FEAT), hT, cT)."""
    H = HIDDEN
    pad = B_PAD - B

    # ---- pad batch to a full sublane group (dummy length-0 sequences) --------
    x_p = jnp.pad(x, ((0, 0), (0, pad), (0, 0)))
    len_p = jnp.pad(lengths.astype(jnp.int32), (0, pad))
    h0_p = jnp.pad(h0, ((0, pad), (0, 0)))
    c0_p = jnp.pad(c0, ((0, pad), (0, 0)))

    # ---- fold the input Linear into the LSTM input weights (f32, exact) ------
    #   ((x @ w_in + b_in) @ w_ih) == x @ (w_in @ w_ih) + (b_in @ w_ih)
    w_comb = jnp.dot(params["w_in"], params["w_ih"])                    # (IN_FEAT, 4H)
    b_comb = jnp.dot(params["b_in"], params["w_ih"]) + params["b_lstm"] # (1, 4H)
    w_hh = params["w_hh"]

    # ---- tanh-via-sigmoid: pre-scale the g-gate columns (2H:3H) by 2 ---------
    g_scale = jnp.concatenate(
        [jnp.ones((2 * H,), jnp.float32),
         jnp.full((H,), 2.0, jnp.float32),
         jnp.ones((H,), jnp.float32)])[None, :]                         # (1, 4H)
    w_comb = w_comb * g_scale
    w_hh = w_hh * g_scale
    b_comb = b_comb * g_scale

    # ---- bf16 MXU operands (fold done in f32 above); biases stay f32 ---------
    x_flat = x_p.reshape(T * B_PAD, IN_FEAT).astype(jnp.bfloat16)
    w_comb_bf = w_comb.astype(jnp.bfloat16)
    w_hh_bf = w_hh.astype(jnp.bfloat16)
    w_out_bf = params["w_out"].astype(jnp.bfloat16)

    # ---- precomputed PackedSequence activity mask, f32 (T*Bp, 1) -------------
    t_idx = jnp.arange(T, dtype=jnp.int32)[:, None]                     # (T, 1)
    act = (t_idx < len_p[None, :]).astype(jnp.float32)                  # (T, Bp)
    act = act.reshape(T * B_PAD, 1)

    full = lambda i: (0, 0)   # whole-array blocks, single grid step

    grid_spec = pltpu.PrefetchScalarGridSpec(
        num_scalar_prefetch=0,
        grid=(1,),
        in_specs=[
            pl.BlockSpec((T * B_PAD, IN_FEAT), full),       # x_flat (bf16)
            pl.BlockSpec((T * B_PAD, 1), full),             # activity mask
            pl.BlockSpec((B_PAD, HIDDEN), full),            # h0
            pl.BlockSpec((B_PAD, HIDDEN), full),            # c0
            pl.BlockSpec((IN_FEAT, 4 * HIDDEN), full),      # w_comb (bf16)
            pl.BlockSpec((HIDDEN, 4 * HIDDEN), full),       # w_hh (bf16)
            pl.BlockSpec((1, 4 * HIDDEN), full),            # b_comb
            pl.BlockSpec((HIDDEN, OUT_FEAT), full),         # w_out (bf16)
            pl.BlockSpec((1, OUT_FEAT), full),              # b_out
        ],
        out_specs=[
            pl.BlockSpec((T * B_PAD, OUT_FEAT), full),      # y_flat
            pl.BlockSpec((B_PAD, HIDDEN), full),            # hT
            pl.BlockSpec((B_PAD, HIDDEN), full),            # cT
        ],
        scratch_shapes=[
            pltpu.VMEM((T * B_PAD, HIDDEN), jnp.float32),   # per-step h collector
        ],
    )

    out_shape = (
        jax.ShapeDtypeStruct((T * B_PAD, OUT_FEAT), jnp.float32),
        jax.ShapeDtypeStruct((B_PAD, HIDDEN), jnp.float32),
        jax.ShapeDtypeStruct((B_PAD, HIDDEN), jnp.float32),
    )

    # NOTE (v7x): with a single sequence this grid=(1,) kernel uses one
    # TensorCore; for batched invocations add a leading "parallel" grid axis
    # over batch tiles so Mosaic can shard across both cores.
    y_flat, hT, cT = pl.pallas_call(
        wrapped_lstm_kernel,
        grid_spec=grid_spec,
        out_shape=out_shape,
        compiler_params=pltpu.CompilerParams(
            dimension_semantics=("arbitrary",)),            # single sequential step
    )(x_flat, act, h0_p, c0_p, w_comb_bf, w_hh_bf, b_comb,
      w_out_bf, params["b_out"])

    # strip batch padding
    y = y_flat.reshape(T, B_PAD, OUT_FEAT)[:, :B, :]
    return y, hT[:B], cT[:B]


wrapped_rnn_forward = jax.jit(wrapped_rnn_forward)


# ---------------- pure-JAX reference (unfused f32, for correctness check) ----
def ref_forward(x, lengths, h0, c0, p):
    H = HIDDEN

    def step(carry, inp):
        h, c = carry
        x_t, t = inp
        u = x_t @ p["w_in"] + p["b_in"]
        gates = u @ p["w_ih"] + h @ p["w_hh"] + p["b_lstm"]
        i_g = jax.nn.sigmoid(gates[:, 0 * H:1 * H])
        f_g = jax.nn.sigmoid(gates[:, 1 * H:2 * H])
        g_g = jnp.tanh(gates[:, 2 * H:3 * H])
        o_g = jax.nn.sigmoid(gates[:, 3 * H:4 * H])
        c_new = f_g * c + i_g * g_g
        h_new = o_g * jnp.tanh(c_new)
        active = (t < lengths)[:, None]
        h2 = jnp.where(active, h_new, h)
        c2 = jnp.where(active, c_new, c)
        y = jnp.where(active, h_new @ p["w_out"] + p["b_out"], 0.0)
        return (h2, c2), y

    (hT, cT), ys = jax.lax.scan(step, (h0, c0), (x, jnp.arange(T)))
    return ys, hT, cT


# ---------------- driver ------------------------------------------------------
if __name__ == "__main__":
    key = jax.random.PRNGKey(0)
    ks = jax.random.split(key, 12)

    def init(k, shape, scale):
        return jax.random.uniform(k, shape, jnp.float32, -1.0, 1.0) * scale

    s_in = 1.0 / np.sqrt(IN_FEAT)
    s_rnn = 1.0 / np.sqrt(HIDDEN)
    s_out = 1.0 / np.sqrt(HIDDEN)

    params = {
        # input_module: Linear(IN_FEAT -> INPUT_SIZE), stored (in, out)
        "w_in": init(ks[0], (IN_FEAT, INPUT_SIZE), s_in),
        "b_in": init(ks[1], (1, INPUT_SIZE), s_in),
        # LSTM weights (PyTorch shapes (4H, in) transposed to (in, 4H))
        "w_ih": init(ks[2], (INPUT_SIZE, 4 * HIDDEN), s_rnn),
        "w_hh": init(ks[3], (HIDDEN, 4 * HIDDEN), s_rnn),
        # b_ih + b_hh combined
        "b_lstm": init(ks[4], (1, 4 * HIDDEN), s_rnn) + init(ks[5], (1, 4 * HIDDEN), s_rnn),
        # output_module: Linear(HIDDEN -> OUT_FEAT), stored (in, out)
        "w_out": init(ks[6], (HIDDEN, OUT_FEAT), s_out),
        "b_out": init(ks[7], (1, OUT_FEAT), s_out),
    }

    # padded packed-sequence data, time-major (T, B, IN_FEAT); lengths sorted desc.
    x = jax.random.normal(ks[8], (T, B, IN_FEAT), jnp.float32)
    lengths = jnp.array([8, 7, 5, 3], dtype=jnp.int32)
    # zero out padding positions (as a packed sequence would imply)
    t_idx = jnp.arange(T)[:, None, None]
    x = jnp.where(t_idx < lengths[None, :, None], x, 0.0)

    h0 = jax.random.normal(ks[9], (B, HIDDEN), jnp.float32) * 0.1
    c0 = jax.random.normal(ks[10], (B, HIDDEN), jnp.float32) * 0.1

    # TODO(synk): PackedSequence pack/unpack (batch_sizes bookkeeping) is host-side
    # glue; the kernel consumes the padded view + lengths directly.

    y, hT, cT = wrapped_rnn_forward(x, lengths, h0, c0, params)
    jax.block_until_ready((y, hT, cT))

    y_ref, hT_ref, cT_ref = ref_forward(x, lengths, h0, c0, params)
    # kernel uses bf16 MXU operands (f32 accumulate / state math) -> 2e-2 tol
    np.testing.assert_allclose(np.asarray(y), np.asarray(y_ref), rtol=2e-2, atol=2e-2)
    np.testing.assert_allclose(np.asarray(hT), np.asarray(hT_ref), rtol=2e-2, atol=2e-2)
    np.testing.assert_allclose(np.asarray(cT), np.asarray(cT_ref), rtol=2e-2, atol=2e-2)

    print("KERNEL_OK")
</pallas_src>

<mosaic_0001>
module attributes {stable_mosaic.version = 11 : i64} {
  func.func @wrapped_lstm_kernel(%arg0: i32, %arg1: memref<64x16xbf16, #tpu.memory_space<vmem>>, %arg2: memref<64x1xf32, #tpu.memory_space<vmem>>, %arg3: memref<8x32xf32, #tpu.memory_space<vmem>>, %arg4: memref<8x32xf32, #tpu.memory_space<vmem>>, %arg5: memref<16x128xbf16, #tpu.memory_space<vmem>>, %arg6: memref<32x128xbf16, #tpu.memory_space<vmem>>, %arg7: memref<1x128xf32, #tpu.memory_space<vmem>>, %arg8: memref<32x16xbf16, #tpu.memory_space<vmem>>, %arg9: memref<1x16xf32, #tpu.memory_space<vmem>>, %arg10: memref<64x16xf32, #tpu.memory_space<vmem>>, %arg11: memref<8x32xf32, #tpu.memory_space<vmem>>, %arg12: memref<8x32xf32, #tpu.memory_space<vmem>>, %arg13: memref<64x32xf32, #tpu.memory_space<vmem>>) attributes {dimension_semantics = [#tpu.dimension_semantics<arbitrary>], iteration_bounds = array<i64: 1>, scalar_prefetch = 0 : i64, scratch_operands = 1 : i64, tpu.core_type = #tpu.core_type<tc>, window_params = [{pipeline_mode = #tpu.pipeline_mode<synchronous>, transform_indices = @transform_0, window_bounds = array<i64: 64, 16>}, {pipeline_mode = #tpu.pipeline_mode<synchronous>, transform_indices = @transform_1, window_bounds = array<i64: 64, 1>}, {pipeline_mode = #tpu.pipeline_mode<synchronous>, transform_indices = @transform_2, window_bounds = array<i64: 8, 32>}, {pipeline_mode = #tpu.pipeline_mode<synchronous>, transform_indices = @transform_3, window_bounds = array<i64: 8, 32>}, {pipeline_mode = #tpu.pipeline_mode<synchronous>, transform_indices = @transform_4, window_bounds = array<i64: 16, 128>}, {pipeline_mode = #tpu.pipeline_mode<synchronous>, transform_indices = @transform_5, window_bounds = array<i64: 32, 128>}, {pipeline_mode = #tpu.pipeline_mode<synchronous>, transform_indices = @transform_6, window_bounds = array<i64: 1, 128>}, {pipeline_mode = #tpu.pipeline_mode<synchronous>, transform_indices = @transform_7, window_bounds = array<i64: 32, 16>}, {pipeline_mode = #tpu.pipeline_mode<synchronous>, transform_indices = @transform_8, window_bounds = array<i64: 1, 16>}, {pipeline_mode = #tpu.pipeline_mode<synchronous>, transform_indices = @transform_9, window_bounds = array<i64: 64, 16>}, {pipeline_mode = #tpu.pipeline_mode<synchronous>, transform_indices = @transform_10, window_bounds = array<i64: 8, 32>}, {pipeline_mode = #tpu.pipeline_mode<synchronous>, transform_indices = @transform_11, window_bounds = array<i64: 8, 32>}]} {
    %c0 = arith.constant 0 : index
    %c0_0 = arith.constant 0 : index
    %0 = vector.load %arg1[%c0, %c0_0] : memref<64x16xbf16, #tpu.memory_space<vmem>>, vector<64x16xbf16>
    %c0_1 = arith.constant 0 : index
    %c0_2 = arith.constant 0 : index
    %1 = vector.load %arg5[%c0_1, %c0_2] : memref<16x128xbf16, #tpu.memory_space<vmem>>, vector<16x128xbf16>
    %cst = arith.constant dense<0.000000e+00> : vector<64x128xf32>
    %2 = tpu.matmul %0, %1, %cst {dimension_numbers = #tpu.dot_dimension_numbers<[1], [0], [0], [1], [0, 0, 1, 1], [], []>} : vector<64x16xbf16>, vector<16x128xbf16>, vector<64x128xf32> -> vector<64x128xf32>
    %c0_3 = arith.constant 0 : index
    %c0_4 = arith.constant 0 : index
    %3 = vector.load %arg7[%c0_3, %c0_4] : memref<1x128xf32, #tpu.memory_space<vmem>>, vector<1x128xf32>
    %4 = vector.broadcast %3 : vector<1x128xf32> to vector<64x128xf32>
    %5 = arith.addf %2, %4 : vector<64x128xf32>
    %c0_5 = arith.constant 0 : index
    %c0_6 = arith.constant 0 : index
    %6 = vector.load %arg2[%c0_5, %c0_6] : memref<64x1xf32, #tpu.memory_space<vmem>>, vector<64x1xf32>
    %c0_7 = arith.constant 0 : index
    %c0_8 = arith.constant 0 : index
    %7 = vector.load %arg6[%c0_7, %c0_8] : memref<32x128xbf16, #tpu.memory_space<vmem>>, vector<32x128xbf16>
    %c0_9 = arith.constant 0 : index
    %c0_10 = arith.constant 0 : index
    %8 = vector.load %arg3[%c0_9, %c0_10] : memref<8x32xf32, #tpu.memory_space<vmem>>, vector<8x32xf32>
    %c0_11 = arith.constant 0 : index
    %c0_12 = arith.constant 0 : index
    %9 = vector.load %arg4[%c0_11, %c0_12] : memref<8x32xf32, #tpu.memory_space<vmem>>, vector<8x32xf32>
    %10 = vector.extract_strided_slice %5 {offsets = [0, 0], sizes = [8, 128], strides = [1, 1]} : vector<64x128xf32> to vector<8x128xf32>
    %11 = arith.truncf %8 : vector<8x32xf32> to vector<8x32xbf16>
    %cst_13 = arith.constant dense<0.000000e+00> : vector<8x128xf32>
    %12 = tpu.matmul %11, %7, %cst_13 {dimension_numbers = #tpu.dot_dimension_numbers<[1], [0], [0], [1], [0, 0, 1, 1], [], []>} : vector<8x32xbf16>, vector<32x128xbf16>, vector<8x128xf32> -> vector<8x128xf32>
    %13 = arith.addf %10, %12 : vector<8x128xf32>
    %14 = arith.negf %13 : vector<8x128xf32>
    %15 = math.exp %14 : vector<8x128xf32>
    %cst_14 = arith.constant 1.000000e+00 : f32
    %16 = vector.broadcast %cst_14 : f32 to vector<8x128xf32>
    %17 = arith.addf %16, %15 : vector<8x128xf32>
    %18 = arith.divf %16, %17 : vector<8x128xf32>
    %19 = vector.extract_strided_slice %18 {offsets = [0, 0], sizes = [8, 32], strides = [1, 1]} : vector<8x128xf32> to vector<8x32xf32>
    %20 = vector.extract_strided_slice %18 {offsets = [0, 32], sizes = [8, 32], strides = [1, 1]} : vector<8x128xf32> to vector<8x32xf32>
    %21 = vector.extract_strided_slice %18 {offsets = [0, 64], sizes = [8, 32], strides = [1, 1]} : vector<8x128xf32> to vector<8x32xf32>
    %cst_15 = arith.constant 2.000000e+00 : f32
    %22 = vector.broadcast %cst_15 : f32 to vector<8x32xf32>
    %23 = arith.mulf %22, %21 : vector<8x32xf32>
    %cst_16 = arith.constant 1.000000e+00 : f32
    %24 = vector.broadcast %cst_16 : f32 to vector<8x32xf32>
    %25 = arith.subf %23, %24 : vector<8x32xf32>
    %26 = vector.extract_strided_slice %18 {offsets = [0, 96], sizes = [8, 32], strides = [1, 1]} : vector<8x128xf32> to vector<8x32xf32>
    %27 = arith.mulf %20, %9 : vector<8x32xf32>
    %28 = arith.mulf %19, %25 : vector<8x32xf32>
    %29 = arith.addf %27, %28 : vector<8x32xf32>
    %30 = math.tanh %29 : vector<8x32xf32>
    %31 = arith.mulf %26, %30 : vector<8x32xf32>
    %c0_17 = arith.constant 0 : index
    %c0_18 = arith.constant 0 : index
    %32 = vector.load %arg13[%c0_17, %c0_18] : memref<64x32xf32, #tpu.memory_space<vmem>>, vector<8x32xf32>
    tpu.vector_store %arg13[%c0_17, %c0_18], %31 {strides = array<i32>} : memref<64x32xf32, #tpu.memory_space<vmem>>, vector<8x32xf32>,
    %33 = vector.extract_strided_slice %6 {offsets = [0, 0], sizes = [8, 1], strides = [1, 1]} : vector<64x1xf32> to vector<8x1xf32>
    %cst_19 = arith.constant 1.000000e+00 : f32
    %34 = vector.broadcast %cst_19 : f32 to vector<8x1xf32>
    %35 = arith.subf %34, %33 : vector<8x1xf32>
    %36 = vector.broadcast %33 : vector<8x1xf32> to vector<8x32xf32>
    %37 = arith.mulf %36, %31 : vector<8x32xf32>
    %38 = vector.broadcast %35 : vector<8x1xf32> to vector<8x32xf32>
    %39 = arith.mulf %38, %8 : vector<8x32xf32>
    %40 = arith.addf %37, %39 : vector<8x32xf32>
    %41 = vector.broadcast %33 : vector<8x1xf32> to vector<8x32xf32>
    %42 = arith.mulf %41, %29 : vector<8x32xf32>
    %43 = vector.broadcast %35 : vector<8x1xf32> to vector<8x32xf32>
    %44 = arith.mulf %43, %9 : vector<8x32xf32>
    %45 = arith.addf %42, %44 : vector<8x32xf32>
    %46 = vector.extract_strided_slice %5 {offsets = [8, 0], sizes = [8, 128], strides = [1, 1]} : vector<64x128xf32> to vector<8x128xf32>
    %47 = arith.truncf %40 : vector<8x32xf32> to vector<8x32xbf16>
    %cst_20 = arith.constant dense<0.000000e+00> : vector<8x128xf32>
    %48 = tpu.matmul %47, %7, %cst_20 {dimension_numbers = #tpu.dot_dimension_numbers<[1], [0], [0], [1], [0, 0, 1, 1], [], []>} : vector<8x32xbf16>, vector<32x128xbf16>, vector<8x128xf32> -> vector<8x128xf32>
    %49 = arith.addf %46, %48 : vector<8x128xf32>
    %50 = arith.negf %49 : vector<8x128xf32>
    %51 = math.exp %50 : vector<8x128xf32>
    %cst_21 = arith.constant 1.000000e+00 : f32
    %52 = vector.broadcast %cst_21 : f32 to vector<8x128xf32>
    %53 = arith.addf %52, %51 : vector<8x128xf32>
    %54 = arith.divf %52, %53 : vector<8x128xf32>
    %55 = vector.extract_strided_slice %54 {offsets = [0, 0], sizes = [8, 32], strides = [1, 1]} : vector<8x128xf32> to vector<8x32xf32>
    %56 = vector.extract_strided_slice %54 {offsets = [0, 32], sizes = [8, 32], strides = [1, 1]} : vector<8x128xf32> to vector<8x32xf32>
    %57 = vector.extract_strided_slice %54 {offsets = [0, 64], sizes = [8, 32], strides = [1, 1]} : vector<8x128xf32> to vector<8x32xf32>
    %cst_22 = arith.constant 2.000000e+00 : f32
    %58 = vector.broadcast %cst_22 : f32 to vector<8x32xf32>
    %59 = arith.mulf %58, %57 : vector<8x32xf32>
    %cst_23 = arith.constant 1.000000e+00 : f32
    %60 = vector.broadcast %cst_23 : f32 to vector<8x32xf32>
    %61 = arith.subf %59, %60 : vector<8x32xf32>
    %62 = vector.extract_strided_slice %54 {offsets = [0, 96], sizes = [8, 32], strides = [1, 1]} : vector<8x128xf32> to vector<8x32xf32>
    %63 = arith.mulf %56, %45 : vector<8x32xf32>
    %64 = arith.mulf %55, %61 : vector<8x32xf32>
    %65 = arith.addf %63, %64 : vector<8x32xf32>
    %66 = math.tanh %65 : vector<8x32xf32>
    %67 = arith.mulf %62, %66 : vector<8x32xf32>
    %c8 = arith.constant 8 : index
    %c0_24 = arith.constant 0 : index
    %68 = vector.load %arg13[%c8, %c0_24] : memref<64x32xf32, #tpu.memory_space<vmem>>, vector<8x32xf32>
    tpu.vector_store %arg13[%c8, %c0_24], %67 {strides = array<i32>} : memref<64x32xf32, #tpu.memory_space<vmem>>, vector<8x32xf32>,
    %69 = vector.extract_strided_slice %6 {offsets = [8, 0], sizes = [8, 1], strides = [1, 1]} : vector<64x1xf32> to vector<8x1xf32>
    %cst_25 = arith.constant 1.000000e+00 : f32
    %70 = vector.broadcast %cst_25 : f32 to vector<8x1xf32>
    %71 = arith.subf %70, %69 : vector<8x1xf32>
    %72 = vector.broadcast %69 : vector<8x1xf32> to vector<8x32xf32>
    %73 = arith.mulf %72, %67 : vector<8x32xf32>
    %74 = vector.broadcast %71 : vector<8x1xf32> to vector<8x32xf32>
    %75 = arith.mulf %74, %40 : vector<8x32xf32>
    %76 = arith.addf %73, %75 : vector<8x32xf32>
    %77 = vector.broadcast %69 : vector<8x1xf32> to vector<8x32xf32>
    %78 = arith.mulf %77, %65 : vector<8x32xf32>
    %79 = vector.broadcast %71 : vector<8x1xf32> to vector<8x32xf32>
    %80 = arith.mulf %79, %45 : vector<8x32xf32>
    %81 = arith.addf %78, %80 : vector<8x32xf32>
    %82 = vector.extract_strided_slice %5 {offsets = [16, 0], sizes = [8, 128], strides = [1, 1]} : vector<64x128xf32> to vector<8x128xf32>
    %83 = arith.truncf %76 : vector<8x32xf32> to vector<8x32xbf16>
    %cst_26 = arith.constant dense<0.000000e+00> : vector<8x128xf32>
    %84 = tpu.matmul %83, %7, %cst_26 {dimension_numbers = #tpu.dot_dimension_numbers<[1], [0], [0], [1], [0, 0, 1, 1], [], []>} : vector<8x32xbf16>, vector<32x128xbf16>, vector<8x128xf32> -> vector<8x128xf32>
    %85 = arith.addf %82, %84 : vector<8x128xf32>
    %86 = arith.negf %85 : vector<8x128xf32>
    %87 = math.exp %86 : vector<8x128xf32>
    %cst_27 = arith.constant 1.000000e+00 : f32
    %88 = vector.broadcast %cst_27 : f32 to vector<8x128xf32>
    %89 = arith.addf %88, %87 : vector<8x128xf32>
    %90 = arith.divf %88, %89 : vector<8x128xf32>
    %91 = vector.extract_strided_slice %90 {offsets = [0, 0], sizes = [8, 32], strides = [1, 1]} : vector<8x128xf32> to vector<8x32xf32>
    %92 = vector.extract_strided_slice %90 {offsets = [0, 32], sizes = [8, 32], strides = [1, 1]} : vector<8x128xf32> to vector<8x32xf32>
    %93 = vector.extract_strided_slice %90 {offsets = [0, 64], sizes = [8, 32], strides = [1, 1]} : vector<8x128xf32> to vector<8x32xf32>
    %cst_28 = arith.constant 2.000000e+00 : f32
    %94 = vector.broadcast %cst_28 : f32 to vector<8x32xf32>
    %95 = arith.mulf %94, %93 : vector<8x32xf32>
    %cst_29 = arith.constant 1.000000e+00 : f32
    %96 = vector.broadcast %cst_29 : f32 to vector<8x32xf32>
    %97 = arith.subf %95, %96 : vector<8x32xf32>
    %98 = vector.extract_strided_slice %90 {offsets = [0, 96], sizes = [8, 32], strides = [1, 1]} : vector<8x128xf32> to vector<8x32xf32>
    %99 = arith.mulf %92, %81 : vector<8x32xf32>
    %100 = arith.mulf %91, %97 : vector<8x32xf32>
    %101 = arith.addf %99, %100 : vector<8x32xf32>
    %102 = math.tanh %101 : vector<8x32xf32>
    %103 = arith.mulf %98, %102 : vector<8x32xf32>
    %c16 = arith.constant 16 : index
    %c0_30 = arith.constant 0 : index
    %104 = vector.load %arg13[%c16, %c0_30] : memref<64x32xf32, #tpu.memory_space<vmem>>, vector<8x32xf32>
    tpu.vector_store %arg13[%c16, %c0_30], %103 {strides = array<i32>} : memref<64x32xf32, #tpu.memory_space<vmem>>, vector<8x32xf32>,
    %105 = vector.extract_strided_slice %6 {offsets = [16, 0], sizes = [8, 1], strides = [1, 1]} : vector<64x1xf32> to vector<8x1xf32>
    %cst_31 = arith.constant 1.000000e+00 : f32
    %106 = vector.broadcast %cst_31 : f32 to vector<8x1xf32>
    %107 = arith.subf %106, %105 : vector<8x1xf32>
    %108 = vector.broadcast %105 : vector<8x1xf32> to vector<8x32xf32>
    %109 = arith.mulf %108, %103 : vector<8x32xf32>
    %110 = vector.broadcast %107 : vector<8x1xf32> to vector<8x32xf32>
    %111 = arith.mulf %110, %76 : vector<8x32xf32>
    %112 = arith.addf %109, %111 : vector<8x32xf32>
    %113 = vector.broadcast %105 : vector<8x1xf32> to vector<8x32xf32>
    %114 = arith.mulf %113, %101 : vector<8x32xf32>
    %115 = vector.broadcast %107 : vector<8x1xf32> to vector<8x32xf32>
    %116 = arith.mulf %115, %81 : vector<8x32xf32>
    %117 = arith.addf %114, %116 : vector<8x32xf32>
    %118 = vector.extract_strided_slice %5 {offsets = [24, 0], sizes = [8, 128], strides = [1, 1]} : vector<64x128xf32> to vector<8x128xf32>
    %119 = arith.truncf %112 : vector<8x32xf32> to vector<8x32xbf16>
    %cst_32 = arith.constant dense<0.000000e+00> : vector<8x128xf32>
    %120 = tpu.matmul %119, %7, %cst_32 {dimension_numbers = #tpu.dot_dimension_numbers<[1], [0], [0], [1], [0, 0, 1, 1], [], []>} : vector<8x32xbf16>, vector<32x128xbf16>, vector<8x128xf32> -> vector<8x128xf32>
    %121 = arith.addf %118, %120 : vector<8x128xf32>
    %122 = arith.negf %121 : vector<8x128xf32>
    %123 = math.exp %122 : vector<8x128xf32>
    %cst_33 = arith.constant 1.000000e+00 : f32
    %124 = vector.broadcast %cst_33 : f32 to vector<8x128xf32>
    %125 = arith.addf %124, %123 : vector<8x128xf32>
    %126 = arith.divf %124, %125 : vector<8x128xf32>
    %127 = vector.extract_strided_slice %126 {offsets = [0, 0], sizes = [8, 32], strides = [1, 1]} : vector<8x128xf32> to vector<8x32xf32>
    %128 = vector.extract_strided_slice %126 {offsets = [0, 32], sizes = [8, 32], strides = [1, 1]} : vector<8x128xf32> to vector<8x32xf32>
    %129 = vector.extract_strided_slice %126 {offsets = [0, 64], sizes = [8, 32], strides = [1, 1]} : vector<8x128xf32> to vector<8x32xf32>
    %cst_34 = arith.constant 2.000000e+00 : f32
    %130 = vector.broadcast %cst_34 : f32 to vector<8x32xf32>
    %131 = arith.mulf %130, %129 : vector<8x32xf32>
    %cst_35 = arith.constant 1.000000e+00 : f32
    %132 = vector.broadcast %cst_35 : f32 to vector<8x32xf32>
    %133 = arith.subf %131, %132 : vector<8x32xf32>
    %134 = vector.extract_strided_slice %126 {offsets = [0, 96], sizes = [8, 32], strides = [1, 1]} : vector<8x128xf32> to vector<8x32xf32>
    %135 = arith.mulf %128, %117 : vector<8x32xf32>
    %136 = arith.mulf %127, %133 : vector<8x32xf32>
    %137 = arith.addf %135, %136 : vector<8x32xf32>
    %138 = math.tanh %137 : vector<8x32xf32>
    %139 = arith.mulf %134, %138 : vector<8x32xf32>
    %c24 = arith.constant 24 : index
    %c0_36 = arith.constant 0 : index
    %140 = vector.load %arg13[%c24, %c0_36] : memref<64x32xf32, #tpu.memory_space<vmem>>, vector<8x32xf32>
    tpu.vector_store %arg13[%c24, %c0_36], %139 {strides = array<i32>} : memref<64x32xf32, #tpu.memory_space<vmem>>, vector<8x32xf32>,
    %141 = vector.extract_strided_slice %6 {offsets = [24, 0], sizes = [8, 1], strides = [1, 1]} : vector<64x1xf32> to vector<8x1xf32>
    %cst_37 = arith.constant 1.000000e+00 : f32
    %142 = vector.broadcast %cst_37 : f32 to vector<8x1xf32>
    %143 = arith.subf %142, %141 : vector<8x1xf32>
    %144 = vector.broadcast %141 : vector<8x1xf32> to vector<8x32xf32>
    %145 = arith.mulf %144, %139 : vector<8x32xf32>
    %146 = vector.broadcast %143 : vector<8x1xf32> to vector<8x32xf32>
    %147 = arith.mulf %146, %112 : vector<8x32xf32>
    %148 = arith.addf %145, %147 : vector<8x32xf32>
    %149 = vector.broadcast %141 : vector<8x1xf32> to vector<8x32xf32>
    %150 = arith.mulf %149, %137 : vector<8x32xf32>
    %151 = vector.broadcast %143 : vector<8x1xf32> to vector<8x32xf32>
    %152 = arith.mulf %151, %117 : vector<8x32xf32>
    %153 = arith.addf %150, %152 : vector<8x32xf32>
    %154 = vector.extract_strided_slice %5 {offsets = [32, 0], sizes = [8, 128], strides = [1, 1]} : vector<64x128xf32> to vector<8x128xf32>
    %155 = arith.truncf %148 : vector<8x32xf32> to vector<8x32xbf16>
    %cst_38 = arith.constant dense<0.000000e+00> : vector<8x128xf32>
    %156 = tpu.matmul %155, %7, %cst_38 {dimension_numbers = #tpu.dot_dimension_numbers<[1], [0], [0], [1], [0, 0, 1, 1], [], []>} : vector<8x32xbf16>, vector<32x128xbf16>, vector<8x128xf32> -> vector<8x128xf32>
    %157 = arith.addf %154, %156 : vector<8x128xf32>
    %158 = arith.negf %157 : vector<8x128xf32>
    %159 = math.exp %158 : vector<8x128xf32>
    %cst_39 = arith.constant 1.000000e+00 : f32
    %160 = vector.broadcast %cst_39 : f32 to vector<8x128xf32>
    %161 = arith.addf %160, %159 : vector<8x128xf32>
    %162 = arith.divf %160, %161 : vector<8x128xf32>
    %163 = vector.extract_strided_slice %162 {offsets = [0, 0], sizes = [8, 32], strides = [1, 1]} : vector<8x128xf32> to vector<8x32xf32>
    %164 = vector.extract_strided_slice %162 {offsets = [0, 32], sizes = [8, 32], strides = [1, 1]} : vector<8x128xf32> to vector<8x32xf32>
    %165 = vector.extract_strided_slice %162 {offsets = [0, 64], sizes = [8, 32], strides = [1, 1]} : vector<8x128xf32> to vector<8x32xf32>
    %cst_40 = arith.constant 2.000000e+00 : f32
    %166 = vector.broadcast %cst_40 : f32 to vector<8x32xf32>
    %167 = arith.mulf %166, %165 : vector<8x32xf32>
    %cst_41 = arith.constant 1.000000e+00 : f32
    %168 = vector.broadcast %cst_41 : f32 to vector<8x32xf32>
    %169 = arith.subf %167, %168 : vector<8x32xf32>
    %170 = vector.extract_strided_slice %162 {offsets = [0, 96], sizes = [8, 32], strides = [1, 1]} : vector<8x128xf32> to vector<8x32xf32>
    %171 = arith.mulf %164, %153 : vector<8x32xf32>
    %172 = arith.mulf %163, %169 : vector<8x32xf32>
    %173 = arith.addf %171, %172 : vector<8x32xf32>
    %174 = math.tanh %173 : vector<8x32xf32>
    %175 = arith.mulf %170, %174 : vector<8x32xf32>
    %c32 = arith.constant 32 : index
    %c0_42 = arith.constant 0 : index
    %176 = vector.load %arg13[%c32, %c0_42] : memref<64x32xf32, #tpu.memory_space<vmem>>, vector<8x32xf32>
    tpu.vector_store %arg13[%c32, %c0_42], %175 {strides = array<i32>} : memref<64x32xf32, #tpu.memory_space<vmem>>, vector<8x32xf32>,
    %177 = vector.extract_strided_slice %6 {offsets = [32, 0], sizes = [8, 1], strides = [1, 1]} : vector<64x1xf32> to vector<8x1xf32>
    %cst_43 = arith.constant 1.000000e+00 : f32
    %178 = vector.broadcast %cst_43 : f32 to vector<8x1xf32>
    %179 = arith.subf %178, %177 : vector<8x1xf32>
    %180 = vector.broadcast %177 : vector<8x1xf32> to vector<8x32xf32>
    %181 = arith.mulf %180, %175 : vector<8x32xf32>
    %182 = vector.broadcast %179 : vector<8x1xf32> to vector<8x32xf32>
    %183 = arith.mulf %182, %148 : vector<8x32xf32>
    %184 = arith.addf %181, %183 : vector<8x32xf32>
    %185 = vector.broadcast %177 : vector<8x1xf32> to vector<8x32xf32>
    %186 = arith.mulf %185, %173 : vector<8x32xf32>
    %187 = vector.broadcast %179 : vector<8x1xf32> to vector<8x32xf32>
    %188 = arith.mulf %187, %153 : vector<8x32xf32>
    %189 = arith.addf %186, %188 : vector<8x32xf32>
    %190 = vector.extract_strided_slice %5 {offsets = [40, 0], sizes = [8, 128], strides = [1, 1]} : vector<64x128xf32> to vector<8x128xf32>
    %191 = arith.truncf %184 : vector<8x32xf32> to vector<8x32xbf16>
    %cst_44 = arith.constant dense<0.000000e+00> : vector<8x128xf32>
    %192 = tpu.matmul %191, %7, %cst_44 {dimension_numbers = #tpu.dot_dimension_numbers<[1], [0], [0], [1], [0, 0, 1, 1], [], []>} : vector<8x32xbf16>, vector<32x128xbf16>, vector<8x128xf32> -> vector<8x128xf32>
    %193 = arith.addf %190, %192 : vector<8x128xf32>
    %194 = arith.negf %193 : vector<8x128xf32>
    %195 = math.exp %194 : vector<8x128xf32>
    %cst_45 = arith.constant 1.000000e+00 : f32
    %196 = vector.broadcast %cst_45 : f32 to vector<8x128xf32>
    %197 = arith.addf %196, %195 : vector<8x128xf32>
    %198 = arith.divf %196, %197 : vector<8x128xf32>
    %199 = vector.extract_strided_slice %198 {offsets = [0, 0], sizes = [8, 32], strides = [1, 1]} : vector<8x128xf32> to vector<8x32xf32>
    %200 = vector.extract_strided_slice %198 {offsets = [0, 32], sizes = [8, 32], strides = [1, 1]} : vector<8x128xf32> to vector<8x32xf32>
    %201 = vector.extract_strided_slice %198 {offsets = [0, 64], sizes = [8, 32], strides = [1, 1]} : vector<8x128xf32> to vector<8x32xf32>
    %cst_46 = arith.constant 2.000000e+00 : f32
    %202 = vector.broadcast %cst_46 : f32 to vector<8x32xf32>
    %203 = arith.mulf %202, %201 : vector<8x32xf32>
    %cst_47 = arith.constant 1.000000e+00 : f32
    %204 = vector.broadcast %cst_47 : f32 to vector<8x32xf32>
    %205 = arith.subf %203, %204 : vector<8x32xf32>
    %206 = vector.extract_strided_slice %198 {offsets = [0, 96], sizes = [8, 32], strides = [1, 1]} : vector<8x128xf32> to vector<8x32xf32>
    %207 = arith.mulf %200, %189 : vector<8x32xf32>
    %208 = arith.mulf %199, %205 : vector<8x32xf32>
    %209 = arith.addf %207, %208 : vector<8x32xf32>
    %210 = math.tanh %209 : vector<8x32xf32>
    %211 = arith.mulf %206, %210 : vector<8x32xf32>
    %c40 = arith.constant 40 : index
    %c0_48 = arith.constant 0 : index
    %212 = vector.load %arg13[%c40, %c0_48] : memref<64x32xf32, #tpu.memory_space<vmem>>, vector<8x32xf32>
    tpu.vector_store %arg13[%c40, %c0_48], %211 {strides = array<i32>} : memref<64x32xf32, #tpu.memory_space<vmem>>, vector<8x32xf32>,
    %213 = vector.extract_strided_slice %6 {offsets = [40, 0], sizes = [8, 1], strides = [1, 1]} : vector<64x1xf32> to vector<8x1xf32>
    %cst_49 = arith.constant 1.000000e+00 : f32
    %214 = vector.broadcast %cst_49 : f32 to vector<8x1xf32>
    %215 = arith.subf %214, %213 : vector<8x1xf32>
    %216 = vector.broadcast %213 : vector<8x1xf32> to vector<8x32xf32>
    %217 = arith.mulf %216, %211 : vector<8x32xf32>
    %218 = vector.broadcast %215 : vector<8x1xf32> to vector<8x32xf32>
    %219 = arith.mulf %218, %184 : vector<8x32xf32>
    %220 = arith.addf %217, %219 : vector<8x32xf32>
    %221 = vector.broadcast %213 : vector<8x1xf32> to vector<8x32xf32>
    %222 = arith.mulf %221, %209 : vector<8x32xf32>
    %223 = vector.broadcast %215 : vector<8x1xf32> to vector<8x32xf32>
    %224 = arith.mulf %223, %189 : vector<8x32xf32>
    %225 = arith.addf %222, %224 : vector<8x32xf32>
    %226 = vector.extract_strided_slice %5 {offsets = [48, 0], sizes = [8, 128], strides = [1, 1]} : vector<64x128xf32> to vector<8x128xf32>
    %227 = arith.truncf %220 : vector<8x32xf32> to vector<8x32xbf16>
    %cst_50 = arith.constant dense<0.000000e+00> : vector<8x128xf32>
    %228 = tpu.matmul %227, %7, %cst_50 {dimension_numbers = #tpu.dot_dimension_numbers<[1], [0], [0], [1], [0, 0, 1, 1], [], []>} : vector<8x32xbf16>, vector<32x128xbf16>, vector<8x128xf32> -> vector<8x128xf32>
    %229 = arith.addf %226, %228 : vector<8x128xf32>
    %230 = arith.negf %229 : vector<8x128xf32>
    %231 = math.exp %230 : vector<8x128xf32>
    %cst_51 = arith.constant 1.000000e+00 : f32
    %232 = vector.broadcast %cst_51 : f32 to vector<8x128xf32>
    %233 = arith.addf %232, %231 : vector<8x128xf32>
    %234 = arith.divf %232, %233 : vector<8x128xf32>
    %235 = vector.extract_strided_slice %234 {offsets = [0, 0], sizes = [8, 32], strides = [1, 1]} : vector<8x128xf32> to vector<8x32xf32>
    %236 = vector.extract_strided_slice %234 {offsets = [0, 32], sizes = [8, 32], strides = [1, 1]} : vector<8x128xf32> to vector<8x32xf32>
    %237 = vector.extract_strided_slice %234 {offsets = [0, 64], sizes = [8, 32], strides = [1, 1]} : vector<8x128xf32> to vector<8x32xf32>
    %cst_52 = arith.constant 2.000000e+00 : f32
    %238 = vector.broadcast %cst_52 : f32 to vector<8x32xf32>
    %239 = arith.mulf %238, %237 : vector<8x32xf32>
    %cst_53 = arith.constant 1.000000e+00 : f32
    %240 = vector.broadcast %cst_53 : f32 to vector<8x32xf32>
    %241 = arith.subf %239, %240 : vector<8x32xf32>
    %242 = vector.extract_strided_slice %234 {offsets = [0, 96], sizes = [8, 32], strides = [1, 1]} : vector<8x128xf32> to vector<8x32xf32>
    %243 = arith.mulf %236, %225 : vector<8x32xf32>
    %244 = arith.mulf %235, %241 : vector<8x32xf32>
    %245 = arith.addf %243, %244 : vector<8x32xf32>
    %246 = math.tanh %245 : vector<8x32xf32>
    %247 = arith.mulf %242, %246 : vector<8x32xf32>
    %c48 = arith.constant 48 : index
    %c0_54 = arith.constant 0 : index
    %248 = vector.load %arg13[%c48, %c0_54] : memref<64x32xf32, #tpu.memory_space<vmem>>, vector<8x32xf32>
    tpu.vector_store %arg13[%c48, %c0_54], %247 {strides = array<i32>} : memref<64x32xf32, #tpu.memory_space<vmem>>, vector<8x32xf32>,
    %249 = vector.extract_strided_slice %6 {offsets = [48, 0], sizes = [8, 1], strides = [1, 1]} : vector<64x1xf32> to vector<8x1xf32>
    %cst_55 = arith.constant 1.000000e+00 : f32
    %250 = vector.broadcast %cst_55 : f32 to vector<8x1xf32>
    %251 = arith.subf %250, %249 : vector<8x1xf32>
    %252 = vector.broadcast %249 : vector<8x1xf32> to vector<8x32xf32>
    %253 = arith.mulf %252, %247 : vector<8x32xf32>
    %254 = vector.broadcast %251 : vector<8x1xf32> to vector<8x32xf32>
    %255 = arith.mulf %254, %220 : vector<8x32xf32>
    %256 = arith.addf %253, %255 : vector<8x32xf32>
    %257 = vector.broadcast %249 : vector<8x1xf32> to vector<8x32xf32>
    %258 = arith.mulf %257, %245 : vector<8x32xf32>
    %259 = vector.broadcast %251 : vector<8x1xf32> to vector<8x32xf32>
    %260 = arith.mulf %259, %225 : vector<8x32xf32>
    %261 = arith.addf %258, %260 : vector<8x32xf32>
    %262 = vector.extract_strided_slice %5 {offsets = [56, 0], sizes = [8, 128], strides = [1, 1]} : vector<64x128xf32> to vector<8x128xf32>
    %263 = arith.truncf %256 : vector<8x32xf32> to vector<8x32xbf16>
    %cst_56 = arith.constant dense<0.000000e+00> : vector<8x128xf32>
    %264 = tpu.matmul %263, %7, %cst_56 {dimension_numbers = #tpu.dot_dimension_numbers<[1], [0], [0], [1], [0, 0, 1, 1], [], []>} : vector<8x32xbf16>, vector<32x128xbf16>, vector<8x128xf32> -> vector<8x128xf32>
    %265 = arith.addf %262, %264 : vector<8x128xf32>
    %266 = arith.negf %265 : vector<8x128xf32>
    %267 = math.exp %266 : vector<8x128xf32>
    %cst_57 = arith.constant 1.000000e+00 : f32
    %268 = vector.broadcast %cst_57 : f32 to vector<8x128xf32>
    %269 = arith.addf %268, %267 : vector<8x128xf32>
    %270 = arith.divf %268, %269 : vector<8x128xf32>
    %271 = vector.extract_strided_slice %270 {offsets = [0, 0], sizes = [8, 32], strides = [1, 1]} : vector<8x128xf32> to vector<8x32xf32>
    %272 = vector.extract_strided_slice %270 {offsets = [0, 32], sizes = [8, 32], strides = [1, 1]} : vector<8x128xf32> to vector<8x32xf32>
    %273 = vector.extract_strided_slice %270 {offsets = [0, 64], sizes = [8, 32], strides = [1, 1]} : vector<8x128xf32> to vector<8x32xf32>
    %cst_58 = arith.constant 2.000000e+00 : f32
    %274 = vector.broadcast %cst_58 : f32 to vector<8x32xf32>
    %275 = arith.mulf %274, %273 : vector<8x32xf32>
    %cst_59 = arith.constant 1.000000e+00 : f32
    %276 = vector.broadcast %cst_59 : f32 to vector<8x32xf32>
    %277 = arith.subf %275, %276 : vector<8x32xf32>
    %278 = vector.extract_strided_slice %270 {offsets = [0, 96], sizes = [8, 32], strides = [1, 1]} : vector<8x128xf32> to vector<8x32xf32>
    %279 = arith.mulf %272, %261 : vector<8x32xf32>
    %280 = arith.mulf %271, %277 : vector<8x32xf32>
    %281 = arith.addf %279, %280 : vector<8x32xf32>
    %282 = math.tanh %281 : vector<8x32xf32>
    %283 = arith.mulf %278, %282 : vector<8x32xf32>
    %c56 = arith.constant 56 : index
    %c0_60 = arith.constant 0 : index
    %284 = vector.load %arg13[%c56, %c0_60] : memref<64x32xf32, #tpu.memory_space<vmem>>, vector<8x32xf32>
    tpu.vector_store %arg13[%c56, %c0_60], %283 {strides = array<i32>} : memref<64x32xf32, #tpu.memory_space<vmem>>, vector<8x32xf32>,
    %285 = vector.extract_strided_slice %6 {offsets = [56, 0], sizes = [8, 1], strides = [1, 1]} : vector<64x1xf32> to vector<8x1xf32>
    %cst_61 = arith.constant 1.000000e+00 : f32
    %286 = vector.broadcast %cst_61 : f32 to vector<8x1xf32>
    %287 = arith.subf %286, %285 : vector<8x1xf32>
    %288 = vector.broadcast %285 : vector<8x1xf32> to vector<8x32xf32>
    %289 = arith.mulf %288, %283 : vector<8x32xf32>
    %290 = vector.broadcast %287 : vector<8x1xf32> to vector<8x32xf32>
    %291 = arith.mulf %290, %256 : vector<8x32xf32>
    %292 = arith.addf %289, %291 : vector<8x32xf32>
    %293 = vector.broadcast %285 : vector<8x1xf32> to vector<8x32xf32>
    %294 = arith.mulf %293, %281 : vector<8x32xf32>
    %295 = vector.broadcast %287 : vector<8x1xf32> to vector<8x32xf32>
    %296 = arith.mulf %295, %261 : vector<8x32xf32>
    %297 = arith.addf %294, %296 : vector<8x32xf32>
    %c0_62 = arith.constant 0 : index
    %c0_63 = arith.constant 0 : index
    %298 = vector.load %arg13[%c0_62, %c0_63] : memref<64x32xf32, #tpu.memory_space<vmem>>, vector<64x32xf32>
    %299 = arith.truncf %298 : vector<64x32xf32> to vector<64x32xbf16>
    %c0_64 = arith.constant 0 : index
    %c0_65 = arith.constant 0 : index
    %300 = vector.load %arg8[%c0_64, %c0_65] : memref<32x16xbf16, #tpu.memory_space<vmem>>, vector<32x16xbf16>
    %cst_66 = arith.constant dense<0.000000e+00> : vector<64x16xf32>
    %301 = tpu.matmul %299, %300, %cst_66 {dimension_numbers = #tpu.dot_dimension_numbers<[1], [0], [0], [1], [0, 0, 1, 1], [], []>} : vector<64x32xbf16>, vector<32x16xbf16>, vector<64x16xf32> -> vector<64x16xf32>
    %c0_67 = arith.constant 0 : index
    %c0_68 = arith.constant 0 : index
    %302 = vector.load %arg9[%c0_67, %c0_68] : memref<1x16xf32, #tpu.memory_space<vmem>>, vector<1x16xf32>
    %303 = vector.broadcast %302 : vector<1x16xf32> to vector<64x16xf32>
    %304 = arith.addf %301, %303 : vector<64x16xf32>
    %305 = vector.broadcast %6 : vector<64x1xf32> to vector<64x16xf32>
    %306 = arith.mulf %304, %305 : vector<64x16xf32>
    %c0_69 = arith.constant 0 : index
    %c0_70 = arith.constant 0 : index
    %307 = vector.load %arg10[%c0_69, %c0_70] : memref<64x16xf32, #tpu.memory_space<vmem>>, vector<64x16xf32>
    tpu.vector_store %arg10[%c0_69, %c0_70], %306 {strides = array<i32>} : memref<64x16xf32, #tpu.memory_space<vmem>>, vector<64x16xf32>,
    %c0_71 = arith.constant 0 : index
    %c0_72 = arith.constant 0 : index
    %308 = vector.load %arg11[%c0_71, %c0_72] : memref<8x32xf32, #tpu.memory_space<vmem>>, vector<8x32xf32>
    tpu.vector_store %arg11[%c0_71, %c0_72], %292 {strides = array<i32>} : memref<8x32xf32, #tpu.memory_space<vmem>>, vector<8x32xf32>,
    %c0_73 = arith.constant 0 : index
    %c0_74 = arith.constant 0 : index
    %309 = vector.load %arg12[%c0_73, %c0_74] : memref<8x32xf32, #tpu.memory_space<vmem>>, vector<8x32xf32>
    tpu.vector_store %arg12[%c0_73, %c0_74], %297 {strides = array<i32>} : memref<8x32xf32, #tpu.memory_space<vmem>>, vector<8x32xf32>,
    return
  }
  func.func @transform_0(%arg0: i32) -> (i32, i32) {
    %c0_i32 = arith.constant 0 : i32
    %c0_i32_0 = arith.constant 0 : i32
    %c0_i32_1 = arith.constant 0 : i32
    return %c0_i32, %c0_i32_0 : i32, i32
  }
  func.func @transform_1(%arg0: i32) -> (i32, i32) {
    %c0_i32 = arith.constant 0 : i32
    %c0_i32_0 = arith.constant 0 : i32
    %c0_i32_1 = arith.constant 0 : i32
    return %c0_i32, %c0_i32_0 : i32, i32
  }
  func.func @transform_2(%arg0: i32) -> (i32, i32) {
    %c0_i32 = arith.constant 0 : i32
    %c0_i32_0 = arith.constant 0 : i32
    %c0_i32_1 = arith.constant 0 : i32
    return %c0_i32, %c0_i32_0 : i32, i32
  }
  func.func @transform_3(%arg0: i32) -> (i32, i32) {
    %c0_i32 = arith.constant 0 : i32
    %c0_i32_0 = arith.constant 0 : i32
    %c0_i32_1 = arith.constant 0 : i32
    return %c0_i32, %c0_i32_0 : i32, i32
  }
  func.func @transform_4(%arg0: i32) -> (i32, i32) {
    %c0_i32 = arith.constant 0 : i32
    %c0_i32_0 = arith.constant 0 : i32
    %c0_i32_1 = arith.constant 0 : i32
    return %c0_i32, %c0_i32_0 : i32, i32
  }
  func.func @transform_5(%arg0: i32) -> (i32, i32) {
    %c0_i32 = arith.constant 0 : i32
    %c0_i32_0 = arith.constant 0 : i32
    %c0_i32_1 = arith.constant 0 : i32
    return %c0_i32, %c0_i32_0 : i32, i32
  }
  func.func @transform_6(%arg0: i32) -> (i32, i32) {
    %c0_i32 = arith.constant 0 : i32
    %c0_i32_0 = arith.constant 0 : i32
    %c0_i32_1 = arith.constant 0 : i32
    return %c0_i32, %c0_i32_0 : i32, i32
  }
  func.func @transform_7(%arg0: i32) -> (i32, i32) {
    %c0_i32 = arith.constant 0 : i32
    %c0_i32_0 = arith.constant 0 : i32
    %c0_i32_1 = arith.constant 0 : i32
    return %c0_i32, %c0_i32_0 : i32, i32
  }
  func.func @transform_8(%arg0: i32) -> (i32, i32) {
    %c0_i32 = arith.constant 0 : i32
    %c0_i32_0 = arith.constant 0 : i32
    %c0_i32_1 = arith.constant 0 : i32
    return %c0_i32, %c0_i32_0 : i32, i32
  }
  func.func @transform_9(%arg0: i32) -> (i32, i32) {
    %c0_i32 = arith.constant 0 : i32
    %c0_i32_0 = arith.constant 0 : i32
    %c0_i32_1 = arith.constant 0 : i32
    return %c0_i32, %c0_i32_0 : i32, i32
  }
  func.func @transform_10(%arg0: i32) -> (i32, i32) {
    %c0_i32 = arith.constant 0 : i32
    %c0_i32_0 = arith.constant 0 : i32
    %c0_i32_1 = arith.constant 0 : i32
    return %c0_i32, %c0_i32_0 : i32, i32
  }
  func.func @transform_11(%arg0: i32) -> (i32, i32) {
    %c0_i32 = arith.constant 0 : i32
    %c0_i32_0 = arith.constant 0 : i32
    %c0_i32_1 = arith.constant 0 : i32
    return %c0_i32, %c0_i32_0 : i32, i32
  }
}

</mosaic_0001>

<bundles_post_ra>
// kernel: wrapped_rnn_forward.1
= control target key start
LH: loop header
LB: loop body
LE: loop exit
PB: predicated region body
PF: predicated region fallthrough
CT: control target
= control target key end

     0   :  { %vm76_vm0 = vcmask 130048   ;;  %vm145_vm1 = vcmask 261120   ;;  %s1048_s28 = smov 32   ;;  %v1049_v28 = vmov 0   ;;  %s1400_s4 = inlined_call_operand.vmem [shape: bf16[16,128], index: 4, kind: input, shape index: {}]   ;;  %s1401_s5 = inlined_call_operand.vmem [shape: bf16[32,128], index: 5, kind: input, shape index: {}]   ;;  %s1402_s0 = inlined_call_operand.vmem [shape: bf16[64,16], index: 0, kind: input, shape index: {}]   ;;  %s1403_s2 = inlined_call_operand.vmem [shape: f32[8,32], index: 2, kind: input, shape index: {}]   ;;  %s1404_s6 = inlined_call_operand.vmem [shape: f32[1,128], index: 6, kind: input, shape index: {}]   ;;  %s1405_s3 = inlined_call_operand.vmem [shape: f32[8,32], index: 3, kind: input, shape index: {}]   ;;  %s1406_s1 = inlined_call_operand.vmem [shape: f32[64,1], index: 1, kind: input, shape index: {}]   ;;  %s1407_s7 = inlined_call_operand.vmem [shape: bf16[32,16], index: 7, kind: input, shape index: {}]   ;;  %s1408_s8 = inlined_call_operand.vmem [shape: f32[1,16], index: 8, kind: input, shape index: {}]   ;;  %s1409_s9 = inlined_call_operand.vmem [shape: f32[64,16], index: 9, kind: output, shape index: {0}]   ;;  %s1410_s11 = inlined_call_operand.vmem [shape: f32[8,32], index: 11, kind: output, shape index: {2}]   ;;  %s1411_s10 = inlined_call_operand.vmem [shape: f32[8,32], index: 10, kind: output, shape index: {1}]  }
   0x1   :  { %v985_v0 = vld [vmem:[%s1400_s4] sm:$0xff]  ;;  %v1117_v1 = vld [vmem:[%s1401_s5 + $0x8] sm:$0xff]  ;;  %994 = vset.pattern.permute.xlu1 %v1049_v28  ;;  %995 = vset.pattern.permute.xlu2 %v1049_v28 }
   0x2   :  { %v981_v2 = vld [vmem:[%s1402_s0] sm:$0xff]  ;;  %96 = vmatpush.bf16.msra.mxu0 %v985_v0  ;;  %155 = vmatpush.bf16.msra.mxu1 %v1117_v1 }
   0x3   :  { %v1126_v3 = vld [vmem:[%s1401_s5] sm:$0xff]  ;;  %248 = vmatpush.bf16.msra.mxu2 %v1117_v1  ;;  %996 = vset.pattern.permute.xlu0 %v1049_v28 }
   0x4   :  { %v1131_v4 = vld [vmem:[%s1403_s2] sm:$0xff] }
   0x5   :  { %933 = vmatmul.msk.bf16.vlgmr.msra.gmra.mxu0 %vm76_vm0, %v981_v2  ;;  %v132_v5 = vpack.c.bf16 %v1131_v4, %v1131_v4  ;;  %v1149_v6 = vld [vmem:[%s1404_s6] ss:$0 sm:$0xff]  ;;  %s1047_s6 = smov 64  }
   0x6   :  { %156 = vmatpush.bf16.msra.mxu1 %v1126_v3  ;;  %v131_v27 = vld [vmem:[%s1405_s3] sm:$0xff]  ;;  %s1050_s3 = smov 96  }
   0x7   :  { %249 = vmatpush.bf16.msra.mxu2 %v1126_v3  ;;  %v118_v31 = vld [vmem:[%s1406_s1] sm:$0xff] }
   0x8   :  { %v210_v32 = vsub.f32 1.0, %v118_v31 }
   0x9   :  { %945 = vmatmul.msk.bf16.vlgmr.msra.gmra.mxu1 %vm145_vm1, %v132_v5 }
   0xa   :  { %329 = vmatpush.bf16.msrb.mxu1 %v1117_v1 }
   0xb   :  { %491 = vmatpush.bf16.msrb.mxu2 %v1117_v1 }
   0xe   :  { %330 = vmatpush.bf16.msrb.mxu1 %v1126_v3 }
   0xf   :  { %492 = vmatpush.bf16.msrb.mxu2 %v1126_v3 }
  0x12   :  { %410 = vmatpush.bf16.msra.mxu1 %v1117_v1 }
  0x16   :  { %411 = vmatpush.bf16.msra.mxu1 %v1126_v3 }
  0x82   :  { %v98_v7 = vpop.f32.mrf.mxu0 }
  0x83   :  { %v99_v8 = vadd.f32 %v1149_v6, %v98_v7 }
  0x86   :  { %v158_v9 = vpop.f32.mrf.mxu1 }
  0x87   :  { %v162_v10 = vadd.f32 %v158_v9, %v99_v8  ;;  %v119_v8 = vld [vmem:[%s1406_s1 + $0x8] sm:$0xff] }
  0x89   :  { %v946_v11 = vmul.f32 -1.442695, %v162_v10 }
  0x8a   :  { %v100_v49 = vpop.f32.mrf.mxu0 }
  0x8b   :  { %999 = vpow2.f32 %v946_v11  ;;  %v101_v50 = vadd.f32 %v1149_v6, %v100_v49  ;;  %v299_v11 = vsub.f32 1.0, %v119_v8 }
  0x8e   :  { %v160_v12 = vpop.f32.mrf.mxu1 }
  0x91   :  { %v1000_v13 = vpop.eup %999 }
  0x92   :  { %v166_v14 = vadd.f32 1.0, %v1000_v13 }
  0x94   :  { %1001 = vrcp.f32 %v166_v14  ;;  %v178_v18 = vand.u32 2147483648, %v166_v14  ;;  %v176_v20 = vand.u32 2147483647, %v166_v14  ;;  %vm172_vm3 = vweird.f32 %v166_v14 }
  0x96   :  { %v179_v22 = vor.u32 1.1754944e-38, %v178_v18  ;;  %vm177_vm5 = vcmp.eq.f32.partialorder %v176_v20, 8.507059e+37 }
  0x9a   :  { %v1002_v15 = vpop.eup %1001 }
  0x9b   :  { %v168_v16 = vmul.f32 %v1002_v15, %v166_v14  ;;  %vm173_vm2 = vweird.f32 %v1002_v15 }
  0x9c   :  { %vm174_vm4 = vmor %vm172_vm3, %vm173_vm2 }
  0x9d   :  { %v169_v17 = vsub.f32 1.0, %v168_v16 }
  0x9f   :  { %v170_v19 = vmul.f32 %v1002_v15, %v169_v17 }
  0xa1   :  { %v171_v21 = vadd.f32 %v1002_v15, %v170_v19  ;;  %v982_v19 = vld [vmem:[%s1402_s0 + $0x8] sm:$0xff] }
  0xa2   :  { %934 = vmatmul.msk.bf16.gmra.mxu0 %vm76_vm0, %v982_v19 }
  0xa3   :  { %v175_v23 = vsel %vm174_vm4, %v1002_v15, %v171_v21 }
  0xa4   :  { %v180_v24 = vsel %vm177_vm5, %v179_v22, %v175_v23 }
  0xa5   :  { %v182_v25 = vmul.f32 2.0, %v180_v24 }
  0xa7   :  { %v947_v26 = vadd.f32 -1.0, %v182_v25 }
  0xa9   :  { %190 = vrot.lane.b32.xlu0 %v947_v26, %s1047_s6 }
  0xb1   :  { %185 = vrot.lane.b32.xlu0 %v131_v27, %s1048_s28 }
 0x11b   :  { %v191_v29 = vpop.permute.xlu0 %190 }
 0x11c   :  { %v193_v30 = vmul.f32 %v191_v29, %v180_v24 }
 0x11e   :  { %195 = vrot.lane.b32.xlu1 %v193_v30, %s1048_s28 }
 0x11f   :  { %v103_v29 = vpop.f32.mrf.mxu0 }
 0x120   :  { %v104_v30 = vadd.f32 %v1149_v6, %v103_v29 }
 0x123   :  { %v186_v33 = vpop.permute.xlu0 %185 }
 0x124   :  { %v188_v34 = vmul.f32 %v186_v33, %v180_v24 }
 0x126   :  { %219 = vperm.xlu1 %994, %v210_v32  }
 0x190   :  { %v196_v35 = vpop.permute.xlu1 %195 }
 0x191   :  { %v198_v36 = vadd.f32 %v196_v35, %v188_v34 }
 0x193   :  { %1003 = vtanh.f32 %v198_v36 }
 0x198   :  { %v220_v37 = vpop.permute.xlu1 %219 }
 0x199   :  { %v1004_v38 = vpop.eup %1003  ;;  %v222_v39 = vmul.f32 %v220_v37, %v1131_v4  ;;  %v229_v40 = vmul.f32 %v220_v37, %v131_v27 }
 0x19a   :  { %201 = vrot.lane.b32.xlu2 %v1004_v38, %s1047_s6 }
 0x19b   :  { %224 = vrot.lane.b32.xlu0 %v222_v39, %s1050_s3 }
 0x1a2   :  { %213 = vperm.xlu2 %995, %v118_v31  }
 0x1a3   :  { %231 = vrot.lane.b32.xlu0 %v229_v40, %s1048_s28 }
 0x1ab   :  { %302 = vperm.xlu0 %996, %v119_v8  }
 0x1f4   :  { %v202_v41 = vpop.permute.xlu2 %201 }
 0x1f5   :  { %v1167_v43 = vmul.f32 %v202_v41, %v180_v24 }
 0x1fc   :  { %v1165_v42 = vpop.permute.xlu2 %213 }
 0x1fd   :  { %v216_v44 = vmul.f32 %v1165_v42, %v1167_v43  ;;  %v228_v13 = vmul.f32 %v1165_v42, %v198_v36 }
 0x20d   :  { %v225_v45 = vpop.permute.xlu0 %224 }
 0x20e   :  { %v227_v46 = vadd.f32 %v225_v45, %v216_v44 }
 0x210   :  { %v235_v47 = vpack.c.bf16 %v227_v46, %v227_v46 }
 0x212   :  { %237 = vrot.lane.b32.xlu1 %v235_v47, %s1048_s28 }
 0x215   :  { %v232_v12 = vpop.permute.xlu0 %231 }
 0x216   :  { %v234_v14 = vadd.f32 %v232_v12, %v228_v13 }
 0x21d   :  { %v1189_v23 = vpop.permute.xlu0 %302 }
 0x284   :  { %v238_v48 = vpop.permute.xlu1 %237 }
 0x285   :  { %948 = vmatmul.msk.bf16.vlgmr.msra.gmra.mxu2 %vm145_vm1, %v238_v48 }
 0x286   :  { %572 = vmatpush.bf16.msra.mxu2 %v1117_v1 }
 0x28a   :  { %573 = vmatpush.bf16.msra.mxu2 %v1126_v3 }
 0x308   :  { %v251_v51 = vpop.f32.mrf.mxu2 }
 0x309   :  { %v255_v52 = vadd.f32 %v251_v51, %v101_v50  ;;  %v120_v51 = vld [vmem:[%s1406_s1 + $0x10] sm:$0xff] }
 0x30b   :  { %v949_v53 = vmul.f32 -1.442695, %v255_v52 }
 0x30d   :  { %1005 = vpow2.f32 %v949_v53 }
 0x310   :  { %v253_v54 = vpop.f32.mrf.mxu2 }
 0x311   :  { %v380_v54 = vsub.f32 1.0, %v120_v51 }
 0x313   :  { %v1006_v55 = vpop.eup %1005 }
 0x314   :  { %v259_v56 = vadd.f32 1.0, %v1006_v55 }
 0x316   :  { %1007 = vrcp.f32 %v259_v56  ;;  %v271_v60 = vand.u32 2147483648, %v259_v56  ;;  %v269_v62 = vand.u32 2147483647, %v259_v56  ;;  %vm265_vm7 = vweird.f32 %v259_v56 }
 0x318   :  { %v272_v0 = vor.u32 1.1754944e-38, %v271_v60  ;;  %vm270_vm9 = vcmp.eq.f32.partialorder %v269_v62, 8.507059e+37 }
 0x31c   :  { %v1008_v57 = vpop.eup %1007 }
 0x31d   :  { %v261_v58 = vmul.f32 %v1008_v57, %v259_v56  ;;  %vm266_vm6 = vweird.f32 %v1008_v57 }
 0x31e   :  { %vm267_vm8 = vmor %vm265_vm7, %vm266_vm6 }
 0x31f   :  { %v262_v59 = vsub.f32 1.0, %v261_v58 }
 0x321   :  { %v263_v61 = vmul.f32 %v1008_v57, %v262_v59 }
 0x323   :  { %v264_v63 = vadd.f32 %v1008_v57, %v263_v61 }
 0x325   :  { %v268_v2 = vsel %vm267_vm8, %v1008_v57, %v264_v63 }
 0x326   :  { %v273_v4 = vsel %vm270_vm9, %v272_v0, %v268_v2 }
 0x327   :  { %v275_v5 = vmul.f32 2.0, %v273_v4  ;;  %v277_v15 = vmul.f32 %v273_v4, %v234_v14 }
 0x329   :  { %v950_v7 = vadd.f32 -1.0, %v275_v5 }
 0x32b   :  { %279 = vrot.lane.b32.xlu2 %v950_v7, %s1047_s6 }
 0x385   :  { %v280_v9 = vpop.permute.xlu2 %279 }
 0x386   :  { %v282_v10 = vmul.f32 %v280_v9, %v273_v4 }
 0x388   :  { %284 = vrot.lane.b32.xlu1 %v282_v10, %s1048_s28  ;;  %v105_v10 = vpop.f32.mrf.mxu0 }
 0x390   :  { %308 = vperm.xlu1 %994, %v299_v11   ;;  %v106_v11 = vadd.f32 %v1149_v6, %v105_v10 }
 0x3fa   :  { %v285_v16 = vpop.permute.xlu1 %284 }
 0x3fb   :  { %v287_v17 = vadd.f32 %v285_v16, %v277_v15 }
 0x3fd   :  { %1009 = vtanh.f32 %v287_v17  ;;  %v313_v56 = vmul.f32 %v1189_v23, %v287_v17 }
 0x402   :  { %v309_v20 = vpop.permute.xlu1 %308 }
 0x403   :  { %v1010_v18 = vpop.eup %1009  ;;  %v311_v24 = vmul.f32 %v309_v20, %v227_v46  ;;  %v314_v55 = vmul.f32 %v309_v20, %v234_v14 }
 0x404   :  { %290 = vrot.lane.b32.xlu2 %v1010_v18, %s1047_s6 }
 0x405   :  { %v315_v57 = vadd.f32 %v314_v55, %v313_v56 }
 0x45e   :  { %v291_v21 = vpop.permute.xlu2 %290 }
 0x45f   :  { %v1187_v22 = vmul.f32 %v291_v21, %v273_v4 }
 0x461   :  { %v305_v25 = vmul.f32 %v1189_v23, %v1187_v22 }
 0x463   :  { %v312_v26 = vadd.f32 %v311_v24, %v305_v25 }
 0x465   :  { %v316_v27 = vpack.c.bf16 %v312_v26, %v312_v26 }
 0x467   :  { %318 = vrot.lane.b32.xlu2 %v316_v27, %s1048_s28 }
 0x4c1   :  { %v319_v28 = vpop.permute.xlu2 %318 }
 0x4c2   :  { %951 = vmatmul.msk.bf16.vlgmr.msrb.gmra.mxu1 %vm145_vm1, %v319_v28 }
 0x4c3   :  { %653 = vmatpush.bf16.msrb.mxu1 %v1117_v1 }
 0x4c7   :  { %654 = vmatpush.bf16.msrb.mxu1 %v1126_v3 }
 0x53f   :  { %v332_v31 = vpop.f32.mrf.mxu1 }
 0x540   :  { %v336_v32 = vadd.f32 %v332_v31, %v104_v30 }
 0x542   :  { %v952_v33 = vmul.f32 -1.442695, %v336_v32  ;;  %v121_v32 = vld [vmem:[%s1406_s1 + $0x18] sm:$0xff] }
 0x544   :  { %1011 = vpow2.f32 %v952_v33 }
 0x547   :  { %v334_v34 = vpop.f32.mrf.mxu1 }
 0x54a   :  { %v1012_v35 = vpop.eup %1011 }
 0x54b   :  { %v340_v36 = vadd.f32 1.0, %v1012_v35  ;;  %v461_v35 = vsub.f32 1.0, %v121_v32 }
 0x54d   :  { %1013 = vrcp.f32 %v340_v36  ;;  %v352_v40 = vand.u32 2147483648, %v340_v36  ;;  %v350_v44 = vand.u32 2147483647, %v340_v36  ;;  %vm346_vm11 = vweird.f32 %v340_v36 }
 0x54f   :  { %v353_v46 = vor.u32 1.1754944e-38, %v352_v40  ;;  %vm351_vm13 = vcmp.eq.f32.partialorder %v350_v44, 8.507059e+37 }
 0x553   :  { %v1014_v37 = vpop.eup %1013 }
 0x554   :  { %v342_v38 = vmul.f32 %v1014_v37, %v340_v36  ;;  %vm347_vm10 = vweird.f32 %v1014_v37 }
 0x555   :  { %vm348_vm12 = vmor %vm346_vm11, %vm347_vm10 }
 0x556   :  { %v343_v39 = vsub.f32 1.0, %v342_v38 }
 0x558   :  { %v344_v41 = vmul.f32 %v1014_v37, %v343_v39 }
 0x55a   :  { %v345_v45 = vadd.f32 %v1014_v37, %v344_v41 }
 0x55c   :  { %v349_v47 = vsel %vm348_vm12, %v1014_v37, %v345_v45  ;;  %v983_v45 = vld [vmem:[%s1402_s0 + $0x10] sm:$0xff] }
 0x55d   :  { %v354_v48 = vsel %vm351_vm13, %v353_v46, %v349_v47  ;;  %935 = vmatmul.msk.bf16.gmra.mxu0 %vm76_vm0, %v983_v45 }
 0x55e   :  { %v356_v49 = vmul.f32 2.0, %v354_v48  ;;  %v358_v58 = vmul.f32 %v354_v48, %v315_v57 }
 0x560   :  { %v953_v50 = vadd.f32 -1.0, %v356_v49 }
 0x562   :  { %360 = vrot.lane.b32.xlu1 %v953_v50, %s1047_s6 }
 0x56a   :  { %383 = vperm.xlu1 %994, %v120_v51  }
 0x5d4   :  { %v361_v52 = vpop.permute.xlu1 %360 }
 0x5d5   :  { %v363_v53 = vmul.f32 %v361_v52, %v354_v48 }
 0x5d7   :  { %365 = vrot.lane.b32.xlu2 %v363_v53, %s1048_s28 }
 0x5da   :  { %v108_v55 = vpop.f32.mrf.mxu0 }
 0x5db   :  { %v109_v56 = vadd.f32 %v1149_v6, %v108_v55 }
 0x5dc   :  { %v1207_v2 = vpop.permute.xlu1 %383 }
 0x5df   :  { %389 = vperm.xlu2 %995, %v380_v54  }
 0x631   :  { %v366_v59 = vpop.permute.xlu2 %365 }
 0x632   :  { %v368_v60 = vadd.f32 %v366_v59, %v358_v58 }
 0x634   :  { %1015 = vtanh.f32 %v368_v60  ;;  %v394_v37 = vmul.f32 %v1207_v2, %v368_v60 }
 0x639   :  { %v390_v62 = vpop.permute.xlu2 %389 }
 0x63a   :  { %v1016_v61 = vpop.eup %1015  ;;  %v392_v4 = vmul.f32 %v390_v62, %v312_v26  ;;  %v395_v36 = vmul.f32 %v390_v62, %v315_v57 }
 0x63b   :  { %371 = vrot.lane.b32.xlu0 %v1016_v61, %s1047_s6 }
 0x63c   :  { %v396_v38 = vadd.f32 %v395_v36, %v394_v37  ;;  %v110_v36 = vpop.f32.mrf.mxu0 }
 0x63d   :  { %v111_v37 = vadd.f32 %v1149_v6, %v110_v36 }
 0x6ad   :  { %v372_v63 = vpop.permute.xlu0 %371 }
 0x6ae   :  { %v1205_v0 = vmul.f32 %v372_v63, %v354_v48 }
 0x6b0   :  { %v386_v5 = vmul.f32 %v1207_v2, %v1205_v0 }
 0x6b2   :  { %v393_v7 = vadd.f32 %v392_v4, %v386_v5 }
 0x6b4   :  { %v397_v8 = vpack.c.bf16 %v393_v7, %v393_v7 }
 0x6b6   :  { %399 = vrot.lane.b32.xlu0 %v397_v8, %s1048_s28 }
 0x728   :  { %v400_v9 = vpop.permute.xlu0 %399 }
 0x729   :  { %954 = vmatmul.msk.bf16.vlgmr.msra.gmra.mxu1 %vm145_vm1, %v400_v9 }
 0x7a6   :  { %v413_v12 = vpop.f32.mrf.mxu1 }
 0x7a7   :  { %v417_v13 = vadd.f32 %v413_v12, %v106_v11 }
 0x7a9   :  { %v955_v14 = vmul.f32 -1.442695, %v417_v13 }
 0x7ab   :  { %1017 = vpow2.f32 %v955_v14  ;;  %v122_v14 = vld [vmem:[%s1406_s1 + $0x20] sm:$0xff] }
 0x7ae   :  { %v415_v15 = vpop.f32.mrf.mxu1 }
 0x7b1   :  { %v1018_v16 = vpop.eup %1017 }
 0x7b2   :  { %v421_v17 = vadd.f32 1.0, %v1018_v16 }
 0x7b4   :  { %1019 = vrcp.f32 %v421_v17  ;;  %v433_v21 = vand.u32 2147483648, %v421_v17  ;;  %v431_v25 = vand.u32 2147483647, %v421_v17  ;;  %vm427_vm15 = vweird.f32 %v421_v17 }
 0x7b6   :  { %v434_v27 = vor.u32 1.1754944e-38, %v433_v21  ;;  %vm432_vm3 = vcmp.eq.f32.partialorder %v431_v25, 8.507059e+37 }
 0x7ba   :  { %v1020_v18 = vpop.eup %1019 }
 0x7bb   :  { %v423_v19 = vmul.f32 %v1020_v18, %v421_v17  ;;  %vm428_vm14 = vweird.f32 %v1020_v18  ;;  %v542_v17 = vsub.f32 1.0, %v122_v14 }
 0x7bc   :  { %vm429_vm2 = vmor %vm427_vm15, %vm428_vm14 }
 0x7bd   :  { %v424_v20 = vsub.f32 1.0, %v423_v19 }
 0x7bf   :  { %v425_v24 = vmul.f32 %v1020_v18, %v424_v20 }
 0x7c1   :  { %v426_v26 = vadd.f32 %v1020_v18, %v425_v24 }
 0x7c3   :  { %v430_v28 = vsel %vm429_vm2, %v1020_v18, %v426_v26 }
 0x7c4   :  { %v435_v29 = vsel %vm432_vm3, %v434_v27, %v430_v28 }
 0x7c5   :  { %v437_v30 = vmul.f32 2.0, %v435_v29  ;;  %v439_v39 = vmul.f32 %v435_v29, %v396_v38 }
 0x7c7   :  { %v956_v31 = vadd.f32 -1.0, %v437_v30 }
 0x7c9   :  { %441 = vrot.lane.b32.xlu1 %v956_v31, %s1047_s6 }
 0x7d1   :  { %464 = vperm.xlu1 %994, %v121_v32  }
 0x83b   :  { %v442_v33 = vpop.permute.xlu1 %441 }
 0x83c   :  { %v444_v34 = vmul.f32 %v442_v33, %v435_v29 }
 0x83e   :  { %446 = vrot.lane.b32.xlu2 %v444_v34, %s1048_s28 }
 0x843   :  { %v1227_v49 = vpop.permute.xlu1 %464 }
 0x846   :  { %470 = vperm.xlu2 %995, %v461_v35  }
 0x898   :  { %v447_v40 = vpop.permute.xlu2 %446 }
 0x899   :  { %v449_v41 = vadd.f32 %v447_v40, %v439_v39 }
 0x89b   :  { %1021 = vtanh.f32 %v449_v41  ;;  %v475_v19 = vmul.f32 %v1227_v49, %v449_v41 }
 0x8a0   :  { %v471_v46 = vpop.permute.xlu2 %470 }
 0x8a1   :  { %v1022_v44 = vpop.eup %1021  ;;  %v473_v50 = vmul.f32 %v471_v46, %v393_v7  ;;  %v476_v18 = vmul.f32 %v471_v46, %v396_v38 }
 0x8a2   :  { %452 = vrot.lane.b32.xlu0 %v1022_v44, %s1047_s6 }
 0x8a3   :  { %v477_v20 = vadd.f32 %v476_v18, %v475_v19 }
 0x914   :  { %v453_v47 = vpop.permute.xlu0 %452 }
 0x915   :  { %v1225_v48 = vmul.f32 %v453_v47, %v435_v29 }
 0x917   :  { %v467_v51 = vmul.f32 %v1227_v49, %v1225_v48 }
 0x919   :  { %v474_v52 = vadd.f32 %v473_v50, %v467_v51 }
 0x91b   :  { %v478_v53 = vpack.c.bf16 %v474_v52, %v474_v52 }
 0x91d   :  { %480 = vrot.lane.b32.xlu0 %v478_v53, %s1048_s28 }
 0x98f   :  { %v481_v54 = vpop.permute.xlu0 %480 }
 0x990   :  { %957 = vmatmul.msk.bf16.vlgmr.msrb.gmra.mxu2 %vm145_vm1, %v481_v54 }
 0x991   :  { %734 = vmatpush.bf16.msrb.mxu2 %v1117_v1 }
 0x995   :  { %735 = vmatpush.bf16.msrb.mxu2 %v1126_v3 }
 0xa13   :  { %v494_v57 = vpop.f32.mrf.mxu2 }
 0xa14   :  { %v498_v58 = vadd.f32 %v494_v57, %v109_v56 }
 0xa16   :  { %v958_v59 = vmul.f32 -1.442695, %v498_v58 }
 0xa18   :  { %1023 = vpow2.f32 %v958_v59 }
 0xa1b   :  { %v496_v60 = vpop.f32.mrf.mxu2 }
 0xa1c   :  { %v123_v60 = vld [vmem:[%s1406_s1 + $0x28] sm:$0xff] }
 0xa1e   :  { %v1024_v61 = vpop.eup %1023 }
 0xa1f   :  { %v502_v62 = vadd.f32 1.0, %v1024_v61 }
 0xa21   :  { %1025 = vrcp.f32 %v502_v62  ;;  %v514_v7 = vand.u32 2147483648, %v502_v62  ;;  %v512_v1 = vand.u32 2147483647, %v502_v62  ;;  %vm508_vm5 = vweird.f32 %v502_v62 }
 0xa23   :  { %v515_v3 = vor.u32 1.1754944e-38, %v514_v7  ;;  %vm513_vm7 = vcmp.eq.f32.partialorder %v512_v1, 8.507059e+37 }
 0xa27   :  { %v1026_v63 = vpop.eup %1025 }
 0xa28   :  { %v504_v4 = vmul.f32 %v1026_v63, %v502_v62  ;;  %vm509_vm4 = vweird.f32 %v1026_v63 }
 0xa29   :  { %vm510_vm6 = vmor %vm508_vm5, %vm509_vm4 }
 0xa2a   :  { %v505_v5 = vsub.f32 1.0, %v504_v4 }
 0xa2c   :  { %v506_v8 = vmul.f32 %v1026_v63, %v505_v5 }
 0xa2e   :  { %v507_v9 = vadd.f32 %v1026_v63, %v506_v8 }
 0xa30   :  { %v511_v10 = vsel %vm510_vm6, %v1026_v63, %v507_v9  ;;  %v623_v63 = vsub.f32 1.0, %v123_v60 }
 0xa31   :  { %v516_v11 = vsel %vm513_vm7, %v515_v3, %v511_v10  ;;  %v984_v10 = vld [vmem:[%s1402_s0 + $0x18] sm:$0xff] }
 0xa32   :  { %v518_v12 = vmul.f32 2.0, %v516_v11  ;;  %v520_v21 = vmul.f32 %v516_v11, %v477_v20  ;;  %936 = vmatmul.msk.bf16.gmra.mxu0 %vm76_vm0, %v984_v10 }
 0xa34   :  { %v959_v13 = vadd.f32 -1.0, %v518_v12 }
 0xa36   :  { %522 = vrot.lane.b32.xlu1 %v959_v13, %s1047_s6 }
 0xa3e   :  { %545 = vperm.xlu1 %994, %v122_v14  }
 0xaa8   :  { %v523_v15 = vpop.permute.xlu1 %522 }
 0xaa9   :  { %v525_v16 = vmul.f32 %v523_v15, %v516_v11 }
 0xaab   :  { %527 = vrot.lane.b32.xlu2 %v525_v16, %s1048_s28 }
 0xab0   :  { %v1245_v30 = vpop.permute.xlu1 %545 }
 0xab3   :  { %551 = vperm.xlu2 %995, %v542_v17  }
 0xb05   :  { %v528_v24 = vpop.permute.xlu2 %527 }
 0xb06   :  { %v530_v25 = vadd.f32 %v528_v24, %v520_v21 }
 0xb08   :  { %1027 = vtanh.f32 %v530_v25  ;;  %v556_v5 = vmul.f32 %v1245_v30, %v530_v25 }
 0xb0d   :  { %v552_v27 = vpop.permute.xlu2 %551 }
 0xb0e   :  { %v1028_v26 = vpop.eup %1027  ;;  %v554_v31 = vmul.f32 %v552_v27, %v474_v52  ;;  %v557_v4 = vmul.f32 %v552_v27, %v477_v20  ;;  %v113_v20 = vpop.f32.mrf.mxu0 }
 0xb0f   :  { %533 = vrot.lane.b32.xlu0 %v1028_v26, %s1047_s6  ;;  %v114_v21 = vadd.f32 %v1149_v6, %v113_v20 }
 0xb10   :  { %v558_v7 = vadd.f32 %v557_v4, %v556_v5 }
 0xb81   :  { %v534_v28 = vpop.permute.xlu0 %533 }
 0xb82   :  { %v1243_v29 = vmul.f32 %v534_v28, %v516_v11 }
 0xb84   :  { %v548_v32 = vmul.f32 %v1245_v30, %v1243_v29 }
 0xb86   :  { %v555_v33 = vadd.f32 %v554_v31, %v548_v32 }
 0xb88   :  { %v559_v34 = vpack.c.bf16 %v555_v33, %v555_v33 }
 0xb8a   :  { %561 = vrot.lane.b32.xlu0 %v559_v34, %s1048_s28 }
 0xbfc   :  { %v562_v35 = vpop.permute.xlu0 %561 }
 0xbfd   :  { %960 = vmatmul.msk.bf16.vlgmr.msra.gmra.mxu2 %vm145_vm1, %v562_v35 }
 0xc80   :  { %v575_v38 = vpop.f32.mrf.mxu2 }
 0xc81   :  { %v579_v39 = vadd.f32 %v575_v38, %v111_v37 }
 0xc83   :  { %v961_v40 = vmul.f32 -1.442695, %v579_v39 }
 0xc85   :  { %1029 = vpow2.f32 %v961_v40 }
 0xc88   :  { %v577_v41 = vpop.f32.mrf.mxu2 }
 0xc8b   :  { %v1030_v44 = vpop.eup %1029 }
 0xc8c   :  { %v583_v45 = vadd.f32 1.0, %v1030_v44 }
 0xc8e   :  { %1031 = vrcp.f32 %v583_v45  ;;  %v595_v51 = vand.u32 2147483648, %v583_v45  ;;  %v593_v53 = vand.u32 2147483647, %v583_v45  ;;  %vm589_vm9 = vweird.f32 %v583_v45 }
 0xc90   :  { %v596_v55 = vor.u32 1.1754944e-38, %v595_v51  ;;  %vm594_vm11 = vcmp.eq.f32.partialorder %v593_v53, 8.507059e+37 }
 0xc94   :  { %v1032_v46 = vpop.eup %1031 }
 0xc95   :  { %v585_v47 = vmul.f32 %v1032_v46, %v583_v45  ;;  %vm590_vm8 = vweird.f32 %v1032_v46 }
 0xc96   :  { %vm591_vm10 = vmor %vm589_vm9, %vm590_vm8 }
 0xc97   :  { %v586_v50 = vsub.f32 1.0, %v585_v47 }
 0xc99   :  { %v587_v52 = vmul.f32 %v1032_v46, %v586_v50 }
 0xc9b   :  { %v588_v54 = vadd.f32 %v1032_v46, %v587_v52 }
 0xc9d   :  { %v592_v56 = vsel %vm591_vm10, %v1032_v46, %v588_v54  ;;  %v124_v46 = vld [vmem:[%s1406_s1 + $0x30] sm:$0xff] }
 0xc9e   :  { %v597_v57 = vsel %vm594_vm11, %v596_v55, %v592_v56  ;;  %v704_v51 = vsub.f32 1.0, %v124_v46 }
 0xc9f   :  { %v599_v58 = vmul.f32 2.0, %v597_v57  ;;  %v601_v8 = vmul.f32 %v597_v57, %v558_v7 }
 0xca1   :  { %v962_v59 = vadd.f32 -1.0, %v599_v58 }
 0xca3   :  { %603 = vrot.lane.b32.xlu1 %v962_v59, %s1047_s6 }
 0xcab   :  { %626 = vperm.xlu1 %994, %v123_v60  }
 0xd15   :  { %v604_v61 = vpop.permute.xlu1 %603 }
 0xd16   :  { %v606_v62 = vmul.f32 %v604_v61, %v597_v57 }
 0xd18   :  { %608 = vrot.lane.b32.xlu2 %v606_v62, %s1048_s28 }
 0xd1d   :  { %v1263_v14 = vpop.permute.xlu1 %626 }
 0xd20   :  { %632 = vperm.xlu2 %995, %v623_v63  }
 0xd72   :  { %v609_v1 = vpop.permute.xlu2 %608 }
 0xd73   :  { %v611_v9 = vadd.f32 %v609_v1, %v601_v8  ;;  %v125_v8 = vld [vmem:[%s1406_s1 + $0x38] sm:$0xff] }
 0xd75   :  { %1033 = vtanh.f32 %v611_v9  ;;  %v637_v53 = vmul.f32 %v1263_v14, %v611_v9 }
 0xd7a   :  { %v633_v11 = vpop.permute.xlu2 %632 }
 0xd7b   :  { %v1034_v3 = vpop.eup %1033  ;;  %v635_v15 = vmul.f32 %v633_v11, %v555_v33  ;;  %v638_v52 = vmul.f32 %v633_v11, %v558_v7 }
 0xd7c   :  { %614 = vrot.lane.b32.xlu0 %v1034_v3, %s1047_s6 }
 0xd7d   :  { %v1275_v54 = vadd.f32 %v638_v52, %v637_v53 }
 0xdee   :  { %v615_v12 = vpop.permute.xlu0 %614 }
 0xdef   :  { %v617_v13 = vmul.f32 %v615_v12, %v597_v57 }
 0xdf1   :  { %v629_v16 = vmul.f32 %v1263_v14, %v617_v13 }
 0xdf3   :  { %v636_v17 = vadd.f32 %v635_v15, %v629_v16 }
 0xdf5   :  { %v640_v18 = vpack.c.bf16 %v636_v17, %v636_v17 }
 0xdf7   :  { %642 = vrot.lane.b32.xlu0 %v640_v18, %s1048_s28 }
 0xe69   :  { %v643_v19 = vpop.permute.xlu0 %642 }
 0xe6a   :  { %963 = vmatmul.msk.bf16.vlgmr.msrb.gmra.mxu1 %vm145_vm1, %v643_v19 }
 0xee7   :  { %v656_v24 = vpop.f32.mrf.mxu1 }
 0xee8   :  { %v660_v25 = vadd.f32 %v656_v24, %v114_v21 }
 0xeea   :  { %v964_v26 = vmul.f32 -1.442695, %v660_v25 }
 0xeec   :  { %1035 = vpow2.f32 %v964_v26 }
 0xeef   :  { %v658_v27 = vpop.f32.mrf.mxu1 }
 0xef2   :  { %v1036_v28 = vpop.eup %1035 }
 0xef3   :  { %v664_v31 = vadd.f32 1.0, %v1036_v28 }
 0xef5   :  { %1037 = vrcp.f32 %v664_v31  ;;  %v676_v35 = vand.u32 2147483648, %v664_v31  ;;  %v674_v37 = vand.u32 2147483647, %v664_v31  ;;  %vm670_vm13 = vweird.f32 %v664_v31 }
 0xef7   :  { %v677_v39 = vor.u32 1.1754944e-38, %v676_v35  ;;  %vm675_vm15 = vcmp.eq.f32.partialorder %v674_v37, 8.507059e+37  ;;  %v988_v35 = vld [vmem:[%s1407_s7] sm:$0xff] }
 0xefb   :  { %v1038_v32 = vpop.eup %1037 }
 0xefc   :  { %v666_v33 = vmul.f32 %v1038_v32, %v664_v31  ;;  %vm671_vm12 = vweird.f32 %v1038_v32 }
 0xefd   :  { %vm672_vm14 = vmor %vm670_vm13, %vm671_vm12 }
 0xefe   :  { %v667_v34 = vsub.f32 1.0, %v666_v33  ;;  %v785_v33 = vsub.f32 1.0, %v125_v8 }
 0xf00   :  { %v668_v36 = vmul.f32 %v1038_v32, %v667_v34  ;;  %v989_v34 = vld [vmem:[%s1407_s7 + $0x8] sm:$0xff] }
 0xf01   :  { %852 = vmatpush.bf16.msra.mxu3 %v989_v34 }
 0xf02   :  { %v669_v38 = vadd.f32 %v1038_v32, %v668_v36 }
 0xf04   :  { %v673_v40 = vsel %vm672_vm14, %v1038_v32, %v669_v38 }
 0xf05   :  { %v678_v41 = vsel %vm675_vm15, %v677_v39, %v673_v40  ;;  %853 = vmatpush.bf16.msra.mxu3 %v988_v35 }
 0xf06   :  { %v680_v44 = vmul.f32 2.0, %v678_v41  ;;  %v682_v55 = vmul.f32 %v678_v41, %v1275_v54 }
 0xf08   :  { %v965_v45 = vadd.f32 -1.0, %v680_v44 }
 0xf0a   :  { %684 = vrot.lane.b32.xlu1 %v965_v45, %s1047_s6 }
 0xf12   :  { %707 = vperm.xlu1 %994, %v124_v46  }
 0xf7c   :  { %v685_v47 = vpop.permute.xlu1 %684 }
 0xf7d   :  { %v687_v50 = vmul.f32 %v685_v47, %v678_v41 }
 0xf7f   :  { %689 = vrot.lane.b32.xlu2 %v687_v50, %s1048_s28 }
 0xf84   :  { %v1284_v62 = vpop.permute.xlu1 %707 }
 0xf87   :  { %713 = vperm.xlu2 %995, %v704_v51  }
 0xfd9   :  { %v690_v56 = vpop.permute.xlu2 %689 }
 0xfda   :  { %v1278_v57 = vadd.f32 %v690_v56, %v682_v55 }
 0xfdc   :  { %1039 = vtanh.f32 %v1278_v57  ;;  %v718_v50 = vmul.f32 %v1284_v62, %v1278_v57 }
 0xfe1   :  { %v1282_v59 = vpop.permute.xlu2 %713 }
 0xfe2   :  { %v1040_v58 = vpop.eup %1039  ;;  %v716_v63 = vmul.f32 %v1282_v59, %v636_v17  ;;  %v719_v47 = vmul.f32 %v1282_v59, %v1275_v54  ;;  %v998_v54 = vld [vmem:[%s1408_s8] ss:$0 sm:$0xff] }
 0xfe3   :  { %695 = vrot.lane.b32.xlu0 %v1040_v58, %s1047_s6 }
 0xfe4   :  { %v720_v51 = vadd.f32 %v719_v47, %v718_v50 }
0x1055   :  { %v696_v60 = vpop.permute.xlu0 %695 }
0x1056   :  { %v698_v61 = vmul.f32 %v696_v60, %v678_v41 }
0x1058   :  { %v710_v4 = vmul.f32 %v1284_v62, %v698_v61 }
0x105a   :  { %v1288_v5 = vadd.f32 %v716_v63, %v710_v4 }
0x105c   :  { %v721_v7 = vpack.c.bf16 %v1288_v5, %v1288_v5 }
0x105e   :  { %723 = vrot.lane.b32.xlu0 %v721_v7, %s1048_s28 }
0x1066   :  { %206 = vrot.lane.b32.xlu0 %v1167_v43, %s1048_s28 }
0x106e   :  { %376 = vrot.lane.b32.xlu0 %v1205_v0, %s1048_s28  ;;  %v115_v0 = vpop.f32.mrf.mxu0 }
0x106f   :  { %v116_v10 = vadd.f32 %v1149_v6, %v115_v0 }
0x1076   :  { %619 = vrot.lane.b32.xlu0 %v617_v13, %s1048_s28 }
0x107e   :  { %788 = vperm.xlu0 %996, %v125_v8  }
0x10d0   :  { %v724_v1 = vpop.permute.xlu0 %723 }
0x10d1   :  { %966 = vmatmul.msk.bf16.vlgmr.msrb.gmra.mxu2 %vm145_vm1, %v724_v1 }
0x10d8   :  { %v207_v9 = vpop.permute.xlu0 %206 }
0x10d9   :  { %209 = vst.msk [vmem:[#allocation2] sm:$0xff] %vm145_vm1, %v207_v9 }
0x10e0   :  { %v377_v3 = vpop.permute.xlu0 %376  ;;  %v802_v38 = vld [vmem:[#allocation2] sm:$0xff] }
0x10e1   :  { %379 = vst.msk [vmem:[#allocation2 + $0x10] sm:$0xff] %vm145_vm1, %v377_v3 }
0x10e8   :  { %v620_v43 = vpop.permute.xlu0 %619  ;;  %v804_v45 = vld [vmem:[#allocation2 + $0x10] sm:$0xff] }
0x10e9   :  { %622 = vst.msk [vmem:[#allocation2 + $0x28] sm:$0xff] %vm145_vm1, %v620_v43 }
0x10f0   :  { %v1333_v58 = vpop.permute.xlu0 %788 }
0x1154   :  { %v737_v11 = vpop.f32.mrf.mxu2 }
0x1155   :  { %v741_v12 = vadd.f32 %v737_v11, %v116_v10 }
0x1157   :  { %v967_v13 = vmul.f32 -1.442695, %v741_v12 }
0x1159   :  { %1041 = vpow2.f32 %v967_v13 }
0x115c   :  { %v739_v15 = vpop.f32.mrf.mxu2 }
0x115f   :  { %v1042_v16 = vpop.eup %1041 }
0x1160   :  { %v745_v17 = vadd.f32 1.0, %v1042_v16  ;;  %v807_v16 = vld [vmem:[#allocation2 + $0x28] sm:$0xff] }
0x1162   :  { %1043 = vrcp.f32 %v745_v17  ;;  %v757_v21 = vand.u32 2147483648, %v745_v17  ;;  %v755_v25 = vand.u32 2147483647, %v745_v17  ;;  %vm751_vm3 = vweird.f32 %v745_v17 }
0x1164   :  { %v758_v27 = vor.u32 1.1754944e-38, %v757_v21  ;;  %vm756_vm5 = vcmp.eq.f32.partialorder %v755_v25, 8.507059e+37 }
0x1168   :  { %v1044_v18 = vpop.eup %1043 }
0x1169   :  { %v747_v19 = vmul.f32 %v1044_v18, %v745_v17  ;;  %vm752_vm2 = vweird.f32 %v1044_v18 }
0x116a   :  { %vm753_vm4 = vmor %vm751_vm3, %vm752_vm2 }
0x116b   :  { %v748_v20 = vsub.f32 1.0, %v747_v19 }
0x116d   :  { %v749_v24 = vmul.f32 %v1044_v18, %v748_v20 }
0x116f   :  { %v750_v26 = vadd.f32 %v1044_v18, %v749_v24 }
0x1171   :  { %v754_v6 = vsel %vm753_vm4, %v1044_v18, %v750_v26 }
0x1172   :  { %v1306_v28 = vsel %vm756_vm5, %v758_v27, %v754_v6 }
0x1173   :  { %v761_v31 = vmul.f32 2.0, %v1306_v28  ;;  %v763_v52 = vmul.f32 %v1306_v28, %v720_v51 }
0x1175   :  { %v968_v32 = vadd.f32 -1.0, %v761_v31 }
0x1177   :  { %765 = vrot.lane.b32.xlu1 %v968_v32, %s1047_s6 }
0x117f   :  { %295 = vrot.lane.b32.xlu1 %v1187_v22, %s1048_s28 }
0x1187   :  { %457 = vrot.lane.b32.xlu1 %v1225_v48, %s1048_s28 }
0x118f   :  { %700 = vrot.lane.b32.xlu1 %v698_v61, %s1048_s28 }
0x1197   :  { %794 = vperm.xlu1 %994, %v785_v33  }
0x11e9   :  { %v766_v36 = vpop.permute.xlu1 %765 }
0x11ea   :  { %v768_v22 = vmul.f32 %v766_v36, %v1306_v28 }
0x11ec   :  { %770 = vrot.lane.b32.xlu2 %v768_v22, %s1048_s28 }
0x11f1   :  { %v296_v48 = vpop.permute.xlu1 %295 }
0x11f2   :  { %298 = vst.msk [vmem:[#allocation2 + $0x8] sm:$0xff] %vm145_vm1, %v296_v48 }
0x11f9   :  { %v458_v37 = vpop.permute.xlu1 %457  ;;  %v803_v39 = vld [vmem:[#allocation2 + $0x8] sm:$0xff] }
0x11fa   :  { %460 = vst.msk [vmem:[#allocation2 + $0x18] sm:$0xff] %vm145_vm1, %v458_v37  ;;  %v810_v40 = vpack.c.bf16 %v803_v39, %v802_v38 }
0x11fc   :  { %977 = vmatmul.msk.bf16.vlgmr.msra.gmra.mxu3 %vm145_vm1, %v810_v40 }
0x1201   :  { %v701_v41 = vpop.permute.xlu1 %700  ;;  %v805_v44 = vld [vmem:[#allocation2 + $0x18] sm:$0xff] }
0x1202   :  { %703 = vst.msk [vmem:[#allocation2 + $0x30] sm:$0xff] %vm145_vm1, %v701_v41  ;;  %v811_v46 = vpack.c.bf16 %v805_v44, %v804_v45 }
0x1209   :  { %v795_v53 = vpop.permute.xlu1 %794  ;;  %v808_v20 = vld [vmem:[#allocation2 + $0x30] sm:$0xff] }
0x120a   :  { %v800_v60 = vmul.f32 %v795_v53, %v720_v51  ;;  %v797_v12 = vmul.f32 %v795_v53, %v1288_v5 }
0x120c   :  { %978 = vmatmul.msk.bf16.gmra.mxu3 %vm145_vm1, %v811_v46 }
0x1246   :  { %v771_v55 = vpop.permute.xlu2 %770 }
0x1247   :  { %v773_v56 = vadd.f32 %v771_v55, %v763_v52 }
0x1249   :  { %1045 = vtanh.f32 %v773_v56  ;;  %v799_v61 = vmul.f32 %v1333_v58, %v773_v56 }
0x124b   :  { %v801_v63 = vadd.f32 %v800_v60, %v799_v61 }
0x124d   :  { %897 = vrot.lane.b32.xlu0 %v801_v63, %s1050_s3 }
0x124f   :  { %v1046_v4 = vpop.eup %1045 }
0x1250   :  { %776 = vrot.lane.b32.xlu2 %v1046_v4, %s1047_s6 }
0x1258   :  { %538 = vrot.lane.b32.xlu2 %v1243_v29, %s1048_s28 }
0x127f   :  { %v855_v57 = vpop.f32.mrf.mxu3 }
0x1280   :  { %v856_v59 = vadd.f32 %v998_v54, %v855_v57 }
0x1282   :  { %v875_v7 = vmul.f32 %v856_v59, %v1165_v42 }
0x1284   :  { %883 = vst.msk [vmem:[%s1409_s9] sm:$0xff] %vm76_vm0, %v875_v7 }
0x1287   :  { %v857_v8 = vpop.f32.mrf.mxu3 }
0x1288   :  { %v858_v1 = vadd.f32 %v998_v54, %v857_v8 }
0x128a   :  { %v876_v9 = vmul.f32 %v858_v1, %v1189_v23 }
0x128c   :  { %884 = vst.msk [vmem:[%s1409_s9 + $0x8] sm:$0xff] %vm76_vm0, %v876_v9 }
0x128f   :  { %v860_v29 = vpop.f32.mrf.mxu3 }
0x1290   :  { %v861_v3 = vadd.f32 %v998_v54, %v860_v29 }
0x1292   :  { %v877_v43 = vmul.f32 %v861_v3, %v1207_v2 }
0x1294   :  { %885 = vst.msk [vmem:[%s1409_s9 + $0x10] sm:$0xff] %vm76_vm0, %v877_v43 }
0x1297   :  { %v862_v42 = vpop.f32.mrf.mxu3 }
0x1298   :  { %v863_v0 = vadd.f32 %v998_v54, %v862_v42 }
0x129a   :  { %v878_v10 = vmul.f32 %v863_v0, %v1227_v49 }
0x129c   :  { %886 = vst.msk [vmem:[%s1409_s9 + $0x18] sm:$0xff] %vm76_vm0, %v878_v10 }
0x12aa   :  { %v777_v23 = vpop.permute.xlu2 %776 }
0x12ab   :  { %v779_v11 = vmul.f32 %v777_v23, %v1306_v28 }
0x12ad   :  { %781 = vrot.lane.b32.xlu2 %v779_v11, %s1048_s28  ;;  %v791_v2 = vmul.f32 %v1333_v58, %v779_v11 }
0x12af   :  { %v798_v15 = vadd.f32 %v797_v12, %v791_v2 }
0x12b2   :  { %v539_v13 = vpop.permute.xlu2 %538 }
0x12b3   :  { %541 = vst.msk [vmem:[#allocation2 + $0x20] sm:$0xff] %vm145_vm1, %v539_v13 }
0x12b5   :  { %892 = vrot.lane.b32.xlu2 %v798_v15, %s1048_s28 }
0x12ba   :  { %v806_v49 = vld [vmem:[#allocation2 + $0x20] sm:$0xff] }
0x12bb   :  { %v812_v17 = vpack.c.bf16 %v807_v16, %v806_v49 }
0x12bd   :  { %979 = vmatmul.msk.bf16.gmra.mxu3 %vm145_vm1, %v812_v17 }
0x12bf   :  { %v898_v18 = vpop.permute.xlu0 %897 }
0x12c0   :  { %900 = vst.msk [vmem:[%s1410_s11] sm:$0xff] %vm145_vm1, %v898_v18 }
0x1307   :  { %v782_v19 = vpop.permute.xlu2 %781 }
0x1308   :  { %784 = vst.msk [vmem:[#allocation2 + $0x38] sm:$0xff] %vm145_vm1, %v782_v19 }
0x130f   :  { %v893_v5 = vpop.permute.xlu2 %892  ;;  %v809_v21 = vld [vmem:[#allocation2 + $0x38] sm:$0xff] }
0x1310   :  { %895 = vst.msk [vmem:[%s1411_s10] sm:$0xff] %vm145_vm1, %v893_v5  ;;  %v813_v24 = vpack.c.bf16 %v809_v21, %v808_v20 }
0x1312   :  { %980 = vmatmul.msk.bf16.gmra.mxu3 %vm145_vm1, %v813_v24 }
0x1340   :  { %v865_v25 = vpop.f32.mrf.mxu3 }
0x1341   :  { %v866_v26 = vadd.f32 %v998_v54, %v865_v25 }
0x1343   :  { %v879_v27 = vmul.f32 %v866_v26, %v1245_v30 }
0x1345   :  { %887 = vst.msk [vmem:[%s1409_s9 + $0x20] sm:$0xff] %vm76_vm0, %v879_v27 }
0x1348   :  { %v867_v6 = vpop.f32.mrf.mxu3 }
0x1349   :  { %v868_v28 = vadd.f32 %v998_v54, %v867_v6 }
0x134b   :  { %v880_v31 = vmul.f32 %v868_v28, %v1263_v14 }
0x134d   :  { %888 = vst.msk [vmem:[%s1409_s9 + $0x28] sm:$0xff] %vm76_vm0, %v880_v31 }
0x1395   :  { %v870_v32 = vpop.f32.mrf.mxu3 }
0x1396   :  { %v871_v33 = vadd.f32 %v998_v54, %v870_v32 }
0x1398   :  { %v881_v34 = vmul.f32 %v871_v33, %v1284_v62 }
0x139a   :  { %889 = vst.msk [vmem:[%s1409_s9 + $0x30] sm:$0xff] %vm76_vm0, %v881_v34 }
0x139d   :  { %v872_v30 = vpop.f32.mrf.mxu3 }
0x139e   :  { %v873_v35 = vadd.f32 %v998_v54, %v872_v30 }
0x13a0   :  { %v882_v36 = vmul.f32 %v873_v35, %v1333_v58 }
0x13a2   :  { %890 = vst.msk [vmem:[%s1409_s9 + $0x38] sm:$0xff] %vm76_vm0, %v882_v36 }

</bundles_post_ra>
